<compile_context>
chip_gen: v5e
topology: v5e:2x2
jax: 0.10.0
libtpu: 0.0.40
codegen_flags: <defaults>
</compile_context>

<pallas_src>
import jax
import jax.numpy as jnp
from jax.experimental import pallas as pl
from jax.experimental.pallas import tpu as pltpu

K = 9            # depthwise kernel size
PAD = K // 2     # 'same' padding


def xunit_kernel(x_ref, w_ref, b_ref, o_ref, xp_ref):
    """One (batch, channel) plane per grid step.

    x_ref  : (1, 1, H, W)   original (un-padded, pre-ReLU) input plane, VMEM
    w_ref  : (C*K*K,)       flattened depthwise weights, SMEM (scalar reads)
    b_ref  : (C,)           depthwise bias, SMEM
    o_ref  : (1, 1, H, W)   output plane, VMEM
    xp_ref : (H+2P, W+2P)   f32 VMEM scratch holding zero-padded relu(x)
    """
    c = pl.program_id(1)
    H = x_ref.shape[2]
    W = x_ref.shape[3]

    # Build the zero-padded relu(x) plane in VMEM (replaces a wrapper-level
    # jnp.pad that would cost a full extra HBM round trip).  relu(0) == 0, so
    # padding-then-relu == relu-then-padding.
    xp_ref[...] = jnp.zeros_like(xp_ref)
    xp_ref[PAD:PAD + H, PAD:PAD + W] = (
        jnp.maximum(x_ref[0, 0, :, :], 0.0).astype(jnp.float32))

    # 81-tap depthwise conv: shifted (H, W) windows times a per-tap scalar
    # weight (VALU work; the window shifts ride the load/XLU path).
    wbase = c * (K * K)
    acc = jnp.full((H, W), b_ref[c], dtype=jnp.float32)
    for dh in range(K):
        for dw in range(K):
            acc = acc + xp_ref[dh:dh + H, dw:dw + W] * w_ref[wbase + dh * K + dw]

    # Gaussian gate (EUP slot, hidden behind the VALU loop), applied to the
    # ORIGINAL (pre-ReLU) input.
    g = jnp.exp(-(acc * acc))
    o_ref[0, 0, :, :] = (g * x_ref[0, 0, :, :].astype(jnp.float32)).astype(o_ref.dtype)


def xunit_forward(x_nchw, weight, bias):
    """XUnit forward.

    x_nchw : (N, C, H, W)  float32 or bfloat16 (PyTorch NCHW convention)
    weight : (C, 1, K, K)  depthwise conv weight (PyTorch layout, groups=C)
    bias   : (C,)          depthwise conv bias
    returns (N, C, H, W)
    """
    N, C, H, W = x_nchw.shape
    w_flat = weight.reshape(C * K * K).astype(jnp.float32)   # row-major: c, kh, kw
    b = bias.astype(jnp.float32)

    # Per-step VMEM: double-buffered input + output planes + padded scratch.
    itemsize = x_nchw.dtype.itemsize
    need = (2 * 2 * H * W * itemsize
            + (H + 2 * PAD) * (W + 2 * PAD) * 4
            + (4 << 20))
    vmem_limit = int(min(max(need, 32 << 20), 100 << 20))

    return pl.pallas_call(
        xunit_kernel,
        out_shape=jax.ShapeDtypeStruct((N, C, H, W), x_nchw.dtype),
        grid_spec=pltpu.PrefetchScalarGridSpec(
            num_scalar_prefetch=0,
            grid=(N, C),
            in_specs=[
                pl.BlockSpec((1, 1, H, W), lambda n, c: (n, c, 0, 0)),
                pl.BlockSpec(memory_space=pltpu.MemorySpace.SMEM),   # weights
                pl.BlockSpec(memory_space=pltpu.MemorySpace.SMEM),   # bias
            ],
            out_specs=pl.BlockSpec((1, 1, H, W), lambda n, c: (n, c, 0, 0)),
            scratch_shapes=[pltpu.VMEM((H + 2 * PAD, W + 2 * PAD), jnp.float32)],
        ),
        compiler_params=pltpu.CompilerParams(
            dimension_semantics=("parallel", "parallel"),
            vmem_limit_bytes=vmem_limit),
    )(x_nchw, w_flat, b)


def _reference_xunit(x, weight, bias):
    """Independent pure-JAX reference (lax depthwise conv)."""
    relu = jnp.maximum(x, 0.0)
    conv = jax.lax.conv_general_dilated(
        relu, weight,
        window_strides=(1, 1), padding="SAME",
        dimension_numbers=("NCHW", "OIHW", "NCHW"),
        feature_group_count=x.shape[1],
        precision=jax.lax.Precision.HIGHEST)
    conv = conv + bias.reshape(1, -1, 1, 1)
    return jnp.exp(-(conv * conv)) * x


if __name__ == "__main__":
    # Small shapes consistent with XUnit(in_channels=4, kernel_size=9).
    N, C, H, W = 2, 4, 16, 16

    key = jax.random.PRNGKey(0)
    kx, kw, kb = jax.random.split(key, 3)
    x = jax.random.normal(kx, (N, C, H, W), dtype=jnp.float32)
    # Deterministic init mimicking nn.Conv2d default (uniform in +-1/sqrt(fan_in)).
    fan_in = 1 * K * K
    bound = 1.0 / (fan_in ** 0.5)
    weight = jax.random.uniform(kw, (C, 1, K, K), jnp.float32, -bound, bound)
    bias = jax.random.uniform(kb, (C,), jnp.float32, -bound, bound)

    out = jax.block_until_ready(xunit_forward(x, weight, bias))
    ref = jax.block_until_ready(_reference_xunit(x, weight, bias))

    assert out.shape == (N, C, H, W)
    assert jnp.allclose(out, ref, rtol=1e-4, atol=1e-4), "mismatch vs reference"

    print("KERNEL_OK")
</pallas_src>

<mosaic_0001>
module attributes {stable_mosaic.version = 11 : i64} {
  func.func @xunit_kernel(%arg0: i32, %arg1: i32, %arg2: memref<1x1x16x16xf32, #tpu.memory_space<vmem>>, %arg3: memref<324xf32, #tpu.memory_space<smem>>, %arg4: memref<4xf32, #tpu.memory_space<smem>>, %arg5: memref<1x1x16x16xf32, #tpu.memory_space<vmem>>, %arg6: memref<24x24xf32, #tpu.memory_space<vmem>>) attributes {dimension_semantics = [#tpu.dimension_semantics<parallel>, #tpu.dimension_semantics<parallel>], iteration_bounds = array<i64: 2, 4>, scalar_prefetch = 0 : i64, scratch_operands = 1 : i64, tpu.core_type = #tpu.core_type<tc>, window_params = [{transform_indices = @transform_0, window_bounds = array<i64: 1, 1, 16, 16>}, {transform_indices = @transform_1, window_bounds = array<i64: 324>}, {transform_indices = @transform_2, window_bounds = array<i64: 4>}, {transform_indices = @transform_3, window_bounds = array<i64: 1, 1, 16, 16>}]} {
    %cst = arith.constant 0.000000e+00 : f32
    %0 = vector.broadcast %cst : f32 to vector<24x24xf32>
    %c0 = arith.constant 0 : index
    %c0_0 = arith.constant 0 : index
    %1 = vector.load %arg6[%c0, %c0_0] : memref<24x24xf32, #tpu.memory_space<vmem>>, vector<24x24xf32>
    tpu.vector_store %arg6[%c0, %c0_0], %0 {strides = array<i32>} : memref<24x24xf32, #tpu.memory_space<vmem>>, vector<24x24xf32>,
    %c0_1 = arith.constant 0 : index
    %c0_2 = arith.constant 0 : index
    %c0_3 = arith.constant 0 : index
    %c0_4 = arith.constant 0 : index
    %2 = vector.load %arg2[%c0_1, %c0_2, %c0_3, %c0_4] : memref<1x1x16x16xf32, #tpu.memory_space<vmem>>, vector<1x1x16x16xf32>
    %3 = vector.shape_cast %2 : vector<1x1x16x16xf32> to vector<16x16xf32>
    %cst_5 = arith.constant 0.000000e+00 : f32
    %4 = vector.broadcast %cst_5 : f32 to vector<16x16xf32>
    %5 = arith.maximumf %3, %4 : vector<16x16xf32>
    %c4 = arith.constant 4 : index
    %c4_6 = arith.constant 4 : index
    %6 = vector.load %arg6[%c4, %c4_6] : memref<24x24xf32, #tpu.memory_space<vmem>>, vector<16x16xf32>
    tpu.vector_store %arg6[%c4, %c4_6], %5 {strides = array<i32>} : memref<24x24xf32, #tpu.memory_space<vmem>>, vector<16x16xf32>,
    %c81_i32 = arith.constant 81 : i32
    %7 = arith.muli %arg1, %c81_i32 : i32
    %8 = arith.index_cast %arg1 : i32 to index
    %9 = memref.load %arg4[%8] : memref<4xf32, #tpu.memory_space<smem>>
    %10 = vector.broadcast %9 : f32 to vector<16x16xf32>
    %c0_7 = arith.constant 0 : index
    %c0_8 = arith.constant 0 : index
    %11 = vector.load %arg6[%c0_7, %c0_8] : memref<24x24xf32, #tpu.memory_space<vmem>>, vector<16x16xf32>
    %c0_i32 = arith.constant 0 : i32
    %12 = arith.addi %7, %c0_i32 : i32
    %c0_i32_9 = arith.constant 0 : i32
    %13 = arith.addi %12, %c0_i32_9 : i32
    %14 = arith.index_cast %13 : i32 to index
    %15 = memref.load %arg3[%14] : memref<324xf32, #tpu.memory_space<smem>>
    %16 = vector.broadcast %15 : f32 to vector<16x16xf32>
    %17 = arith.mulf %11, %16 : vector<16x16xf32>
    %18 = arith.addf %10, %17 : vector<16x16xf32>
    %c0_10 = arith.constant 0 : index
    %c1 = arith.constant 1 : index
    %19 = vector.load %arg6[%c0_10, %c1] : memref<24x24xf32, #tpu.memory_space<vmem>>, vector<16x16xf32>
    %c0_i32_11 = arith.constant 0 : i32
    %20 = arith.addi %7, %c0_i32_11 : i32
    %c1_i32 = arith.constant 1 : i32
    %21 = arith.addi %20, %c1_i32 : i32
    %22 = arith.index_cast %21 : i32 to index
    %23 = memref.load %arg3[%22] : memref<324xf32, #tpu.memory_space<smem>>
    %24 = vector.broadcast %23 : f32 to vector<16x16xf32>
    %25 = arith.mulf %19, %24 : vector<16x16xf32>
    %26 = arith.addf %18, %25 : vector<16x16xf32>
    %c0_12 = arith.constant 0 : index
    %c2 = arith.constant 2 : index
    %27 = vector.load %arg6[%c0_12, %c2] : memref<24x24xf32, #tpu.memory_space<vmem>>, vector<16x16xf32>
    %c0_i32_13 = arith.constant 0 : i32
    %28 = arith.addi %7, %c0_i32_13 : i32
    %c2_i32 = arith.constant 2 : i32
    %29 = arith.addi %28, %c2_i32 : i32
    %30 = arith.index_cast %29 : i32 to index
    %31 = memref.load %arg3[%30] : memref<324xf32, #tpu.memory_space<smem>>
    %32 = vector.broadcast %31 : f32 to vector<16x16xf32>
    %33 = arith.mulf %27, %32 : vector<16x16xf32>
    %34 = arith.addf %26, %33 : vector<16x16xf32>
    %c0_14 = arith.constant 0 : index
    %c3 = arith.constant 3 : index
    %35 = vector.load %arg6[%c0_14, %c3] : memref<24x24xf32, #tpu.memory_space<vmem>>, vector<16x16xf32>
    %c0_i32_15 = arith.constant 0 : i32
    %36 = arith.addi %7, %c0_i32_15 : i32
    %c3_i32 = arith.constant 3 : i32
    %37 = arith.addi %36, %c3_i32 : i32
    %38 = arith.index_cast %37 : i32 to index
    %39 = memref.load %arg3[%38] : memref<324xf32, #tpu.memory_space<smem>>
    %40 = vector.broadcast %39 : f32 to vector<16x16xf32>
    %41 = arith.mulf %35, %40 : vector<16x16xf32>
    %42 = arith.addf %34, %41 : vector<16x16xf32>
    %c0_16 = arith.constant 0 : index
    %c4_17 = arith.constant 4 : index
    %43 = vector.load %arg6[%c0_16, %c4_17] : memref<24x24xf32, #tpu.memory_space<vmem>>, vector<16x16xf32>
    %c0_i32_18 = arith.constant 0 : i32
    %44 = arith.addi %7, %c0_i32_18 : i32
    %c4_i32 = arith.constant 4 : i32
    %45 = arith.addi %44, %c4_i32 : i32
    %46 = arith.index_cast %45 : i32 to index
    %47 = memref.load %arg3[%46] : memref<324xf32, #tpu.memory_space<smem>>
    %48 = vector.broadcast %47 : f32 to vector<16x16xf32>
    %49 = arith.mulf %43, %48 : vector<16x16xf32>
    %50 = arith.addf %42, %49 : vector<16x16xf32>
    %c0_19 = arith.constant 0 : index
    %c5 = arith.constant 5 : index
    %51 = vector.load %arg6[%c0_19, %c5] : memref<24x24xf32, #tpu.memory_space<vmem>>, vector<16x16xf32>
    %c0_i32_20 = arith.constant 0 : i32
    %52 = arith.addi %7, %c0_i32_20 : i32
    %c5_i32 = arith.constant 5 : i32
    %53 = arith.addi %52, %c5_i32 : i32
    %54 = arith.index_cast %53 : i32 to index
    %55 = memref.load %arg3[%54] : memref<324xf32, #tpu.memory_space<smem>>
    %56 = vector.broadcast %55 : f32 to vector<16x16xf32>
    %57 = arith.mulf %51, %56 : vector<16x16xf32>
    %58 = arith.addf %50, %57 : vector<16x16xf32>
    %c0_21 = arith.constant 0 : index
    %c6 = arith.constant 6 : index
    %59 = vector.load %arg6[%c0_21, %c6] : memref<24x24xf32, #tpu.memory_space<vmem>>, vector<16x16xf32>
    %c0_i32_22 = arith.constant 0 : i32
    %60 = arith.addi %7, %c0_i32_22 : i32
    %c6_i32 = arith.constant 6 : i32
    %61 = arith.addi %60, %c6_i32 : i32
    %62 = arith.index_cast %61 : i32 to index
    %63 = memref.load %arg3[%62] : memref<324xf32, #tpu.memory_space<smem>>
    %64 = vector.broadcast %63 : f32 to vector<16x16xf32>
    %65 = arith.mulf %59, %64 : vector<16x16xf32>
    %66 = arith.addf %58, %65 : vector<16x16xf32>
    %c0_23 = arith.constant 0 : index
    %c7 = arith.constant 7 : index
    %67 = vector.load %arg6[%c0_23, %c7] : memref<24x24xf32, #tpu.memory_space<vmem>>, vector<16x16xf32>
    %c0_i32_24 = arith.constant 0 : i32
    %68 = arith.addi %7, %c0_i32_24 : i32
    %c7_i32 = arith.constant 7 : i32
    %69 = arith.addi %68, %c7_i32 : i32
    %70 = arith.index_cast %69 : i32 to index
    %71 = memref.load %arg3[%70] : memref<324xf32, #tpu.memory_space<smem>>
    %72 = vector.broadcast %71 : f32 to vector<16x16xf32>
    %73 = arith.mulf %67, %72 : vector<16x16xf32>
    %74 = arith.addf %66, %73 : vector<16x16xf32>
    %c0_25 = arith.constant 0 : index
    %c8 = arith.constant 8 : index
    %75 = vector.load %arg6[%c0_25, %c8] : memref<24x24xf32, #tpu.memory_space<vmem>>, vector<16x16xf32>
    %c0_i32_26 = arith.constant 0 : i32
    %76 = arith.addi %7, %c0_i32_26 : i32
    %c8_i32 = arith.constant 8 : i32
    %77 = arith.addi %76, %c8_i32 : i32
    %78 = arith.index_cast %77 : i32 to index
    %79 = memref.load %arg3[%78] : memref<324xf32, #tpu.memory_space<smem>>
    %80 = vector.broadcast %79 : f32 to vector<16x16xf32>
    %81 = arith.mulf %75, %80 : vector<16x16xf32>
    %82 = arith.addf %74, %81 : vector<16x16xf32>
    %c1_27 = arith.constant 1 : index
    %c0_28 = arith.constant 0 : index
    %83 = vector.load %arg6[%c1_27, %c0_28] : memref<24x24xf32, #tpu.memory_space<vmem>>, vector<16x16xf32>
    %c9_i32 = arith.constant 9 : i32
    %84 = arith.addi %7, %c9_i32 : i32
    %c0_i32_29 = arith.constant 0 : i32
    %85 = arith.addi %84, %c0_i32_29 : i32
    %86 = arith.index_cast %85 : i32 to index
    %87 = memref.load %arg3[%86] : memref<324xf32, #tpu.memory_space<smem>>
    %88 = vector.broadcast %87 : f32 to vector<16x16xf32>
    %89 = arith.mulf %83, %88 : vector<16x16xf32>
    %90 = arith.addf %82, %89 : vector<16x16xf32>
    %c1_30 = arith.constant 1 : index
    %c1_31 = arith.constant 1 : index
    %91 = vector.load %arg6[%c1_30, %c1_31] : memref<24x24xf32, #tpu.memory_space<vmem>>, vector<16x16xf32>
    %c9_i32_32 = arith.constant 9 : i32
    %92 = arith.addi %7, %c9_i32_32 : i32
    %c1_i32_33 = arith.constant 1 : i32
    %93 = arith.addi %92, %c1_i32_33 : i32
    %94 = arith.index_cast %93 : i32 to index
    %95 = memref.load %arg3[%94] : memref<324xf32, #tpu.memory_space<smem>>
    %96 = vector.broadcast %95 : f32 to vector<16x16xf32>
    %97 = arith.mulf %91, %96 : vector<16x16xf32>
    %98 = arith.addf %90, %97 : vector<16x16xf32>
    %c1_34 = arith.constant 1 : index
    %c2_35 = arith.constant 2 : index
    %99 = vector.load %arg6[%c1_34, %c2_35] : memref<24x24xf32, #tpu.memory_space<vmem>>, vector<16x16xf32>
    %c9_i32_36 = arith.constant 9 : i32
    %100 = arith.addi %7, %c9_i32_36 : i32
    %c2_i32_37 = arith.constant 2 : i32
    %101 = arith.addi %100, %c2_i32_37 : i32
    %102 = arith.index_cast %101 : i32 to index
    %103 = memref.load %arg3[%102] : memref<324xf32, #tpu.memory_space<smem>>
    %104 = vector.broadcast %103 : f32 to vector<16x16xf32>
    %105 = arith.mulf %99, %104 : vector<16x16xf32>
    %106 = arith.addf %98, %105 : vector<16x16xf32>
    %c1_38 = arith.constant 1 : index
    %c3_39 = arith.constant 3 : index
    %107 = vector.load %arg6[%c1_38, %c3_39] : memref<24x24xf32, #tpu.memory_space<vmem>>, vector<16x16xf32>
    %c9_i32_40 = arith.constant 9 : i32
    %108 = arith.addi %7, %c9_i32_40 : i32
    %c3_i32_41 = arith.constant 3 : i32
    %109 = arith.addi %108, %c3_i32_41 : i32
    %110 = arith.index_cast %109 : i32 to index
    %111 = memref.load %arg3[%110] : memref<324xf32, #tpu.memory_space<smem>>
    %112 = vector.broadcast %111 : f32 to vector<16x16xf32>
    %113 = arith.mulf %107, %112 : vector<16x16xf32>
    %114 = arith.addf %106, %113 : vector<16x16xf32>
    %c1_42 = arith.constant 1 : index
    %c4_43 = arith.constant 4 : index
    %115 = vector.load %arg6[%c1_42, %c4_43] : memref<24x24xf32, #tpu.memory_space<vmem>>, vector<16x16xf32>
    %c9_i32_44 = arith.constant 9 : i32
    %116 = arith.addi %7, %c9_i32_44 : i32
    %c4_i32_45 = arith.constant 4 : i32
    %117 = arith.addi %116, %c4_i32_45 : i32
    %118 = arith.index_cast %117 : i32 to index
    %119 = memref.load %arg3[%118] : memref<324xf32, #tpu.memory_space<smem>>
    %120 = vector.broadcast %119 : f32 to vector<16x16xf32>
    %121 = arith.mulf %115, %120 : vector<16x16xf32>
    %122 = arith.addf %114, %121 : vector<16x16xf32>
    %c1_46 = arith.constant 1 : index
    %c5_47 = arith.constant 5 : index
    %123 = vector.load %arg6[%c1_46, %c5_47] : memref<24x24xf32, #tpu.memory_space<vmem>>, vector<16x16xf32>
    %c9_i32_48 = arith.constant 9 : i32
    %124 = arith.addi %7, %c9_i32_48 : i32
    %c5_i32_49 = arith.constant 5 : i32
    %125 = arith.addi %124, %c5_i32_49 : i32
    %126 = arith.index_cast %125 : i32 to index
    %127 = memref.load %arg3[%126] : memref<324xf32, #tpu.memory_space<smem>>
    %128 = vector.broadcast %127 : f32 to vector<16x16xf32>
    %129 = arith.mulf %123, %128 : vector<16x16xf32>
    %130 = arith.addf %122, %129 : vector<16x16xf32>
    %c1_50 = arith.constant 1 : index
    %c6_51 = arith.constant 6 : index
    %131 = vector.load %arg6[%c1_50, %c6_51] : memref<24x24xf32, #tpu.memory_space<vmem>>, vector<16x16xf32>
    %c9_i32_52 = arith.constant 9 : i32
    %132 = arith.addi %7, %c9_i32_52 : i32
    %c6_i32_53 = arith.constant 6 : i32
    %133 = arith.addi %132, %c6_i32_53 : i32
    %134 = arith.index_cast %133 : i32 to index
    %135 = memref.load %arg3[%134] : memref<324xf32, #tpu.memory_space<smem>>
    %136 = vector.broadcast %135 : f32 to vector<16x16xf32>
    %137 = arith.mulf %131, %136 : vector<16x16xf32>
    %138 = arith.addf %130, %137 : vector<16x16xf32>
    %c1_54 = arith.constant 1 : index
    %c7_55 = arith.constant 7 : index
    %139 = vector.load %arg6[%c1_54, %c7_55] : memref<24x24xf32, #tpu.memory_space<vmem>>, vector<16x16xf32>
    %c9_i32_56 = arith.constant 9 : i32
    %140 = arith.addi %7, %c9_i32_56 : i32
    %c7_i32_57 = arith.constant 7 : i32
    %141 = arith.addi %140, %c7_i32_57 : i32
    %142 = arith.index_cast %141 : i32 to index
    %143 = memref.load %arg3[%142] : memref<324xf32, #tpu.memory_space<smem>>
    %144 = vector.broadcast %143 : f32 to vector<16x16xf32>
    %145 = arith.mulf %139, %144 : vector<16x16xf32>
    %146 = arith.addf %138, %145 : vector<16x16xf32>
    %c1_58 = arith.constant 1 : index
    %c8_59 = arith.constant 8 : index
    %147 = vector.load %arg6[%c1_58, %c8_59] : memref<24x24xf32, #tpu.memory_space<vmem>>, vector<16x16xf32>
    %c9_i32_60 = arith.constant 9 : i32
    %148 = arith.addi %7, %c9_i32_60 : i32
    %c8_i32_61 = arith.constant 8 : i32
    %149 = arith.addi %148, %c8_i32_61 : i32
    %150 = arith.index_cast %149 : i32 to index
    %151 = memref.load %arg3[%150] : memref<324xf32, #tpu.memory_space<smem>>
    %152 = vector.broadcast %151 : f32 to vector<16x16xf32>
    %153 = arith.mulf %147, %152 : vector<16x16xf32>
    %154 = arith.addf %146, %153 : vector<16x16xf32>
    %c2_62 = arith.constant 2 : index
    %c0_63 = arith.constant 0 : index
    %155 = vector.load %arg6[%c2_62, %c0_63] : memref<24x24xf32, #tpu.memory_space<vmem>>, vector<16x16xf32>
    %c18_i32 = arith.constant 18 : i32
    %156 = arith.addi %7, %c18_i32 : i32
    %c0_i32_64 = arith.constant 0 : i32
    %157 = arith.addi %156, %c0_i32_64 : i32
    %158 = arith.index_cast %157 : i32 to index
    %159 = memref.load %arg3[%158] : memref<324xf32, #tpu.memory_space<smem>>
    %160 = vector.broadcast %159 : f32 to vector<16x16xf32>
    %161 = arith.mulf %155, %160 : vector<16x16xf32>
    %162 = arith.addf %154, %161 : vector<16x16xf32>
    %c2_65 = arith.constant 2 : index
    %c1_66 = arith.constant 1 : index
    %163 = vector.load %arg6[%c2_65, %c1_66] : memref<24x24xf32, #tpu.memory_space<vmem>>, vector<16x16xf32>
    %c18_i32_67 = arith.constant 18 : i32
    %164 = arith.addi %7, %c18_i32_67 : i32
    %c1_i32_68 = arith.constant 1 : i32
    %165 = arith.addi %164, %c1_i32_68 : i32
    %166 = arith.index_cast %165 : i32 to index
    %167 = memref.load %arg3[%166] : memref<324xf32, #tpu.memory_space<smem>>
    %168 = vector.broadcast %167 : f32 to vector<16x16xf32>
    %169 = arith.mulf %163, %168 : vector<16x16xf32>
    %170 = arith.addf %162, %169 : vector<16x16xf32>
    %c2_69 = arith.constant 2 : index
    %c2_70 = arith.constant 2 : index
    %171 = vector.load %arg6[%c2_69, %c2_70] : memref<24x24xf32, #tpu.memory_space<vmem>>, vector<16x16xf32>
    %c18_i32_71 = arith.constant 18 : i32
    %172 = arith.addi %7, %c18_i32_71 : i32
    %c2_i32_72 = arith.constant 2 : i32
    %173 = arith.addi %172, %c2_i32_72 : i32
    %174 = arith.index_cast %173 : i32 to index
    %175 = memref.load %arg3[%174] : memref<324xf32, #tpu.memory_space<smem>>
    %176 = vector.broadcast %175 : f32 to vector<16x16xf32>
    %177 = arith.mulf %171, %176 : vector<16x16xf32>
    %178 = arith.addf %170, %177 : vector<16x16xf32>
    %c2_73 = arith.constant 2 : index
    %c3_74 = arith.constant 3 : index
    %179 = vector.load %arg6[%c2_73, %c3_74] : memref<24x24xf32, #tpu.memory_space<vmem>>, vector<16x16xf32>
    %c18_i32_75 = arith.constant 18 : i32
    %180 = arith.addi %7, %c18_i32_75 : i32
    %c3_i32_76 = arith.constant 3 : i32
    %181 = arith.addi %180, %c3_i32_76 : i32
    %182 = arith.index_cast %181 : i32 to index
    %183 = memref.load %arg3[%182] : memref<324xf32, #tpu.memory_space<smem>>
    %184 = vector.broadcast %183 : f32 to vector<16x16xf32>
    %185 = arith.mulf %179, %184 : vector<16x16xf32>
    %186 = arith.addf %178, %185 : vector<16x16xf32>
    %c2_77 = arith.constant 2 : index
    %c4_78 = arith.constant 4 : index
    %187 = vector.load %arg6[%c2_77, %c4_78] : memref<24x24xf32, #tpu.memory_space<vmem>>, vector<16x16xf32>
    %c18_i32_79 = arith.constant 18 : i32
    %188 = arith.addi %7, %c18_i32_79 : i32
    %c4_i32_80 = arith.constant 4 : i32
    %189 = arith.addi %188, %c4_i32_80 : i32
    %190 = arith.index_cast %189 : i32 to index
    %191 = memref.load %arg3[%190] : memref<324xf32, #tpu.memory_space<smem>>
    %192 = vector.broadcast %191 : f32 to vector<16x16xf32>
    %193 = arith.mulf %187, %192 : vector<16x16xf32>
    %194 = arith.addf %186, %193 : vector<16x16xf32>
    %c2_81 = arith.constant 2 : index
    %c5_82 = arith.constant 5 : index
    %195 = vector.load %arg6[%c2_81, %c5_82] : memref<24x24xf32, #tpu.memory_space<vmem>>, vector<16x16xf32>
    %c18_i32_83 = arith.constant 18 : i32
    %196 = arith.addi %7, %c18_i32_83 : i32
    %c5_i32_84 = arith.constant 5 : i32
    %197 = arith.addi %196, %c5_i32_84 : i32
    %198 = arith.index_cast %197 : i32 to index
    %199 = memref.load %arg3[%198] : memref<324xf32, #tpu.memory_space<smem>>
    %200 = vector.broadcast %199 : f32 to vector<16x16xf32>
    %201 = arith.mulf %195, %200 : vector<16x16xf32>
    %202 = arith.addf %194, %201 : vector<16x16xf32>
    %c2_85 = arith.constant 2 : index
    %c6_86 = arith.constant 6 : index
    %203 = vector.load %arg6[%c2_85, %c6_86] : memref<24x24xf32, #tpu.memory_space<vmem>>, vector<16x16xf32>
    %c18_i32_87 = arith.constant 18 : i32
    %204 = arith.addi %7, %c18_i32_87 : i32
    %c6_i32_88 = arith.constant 6 : i32
    %205 = arith.addi %204, %c6_i32_88 : i32
    %206 = arith.index_cast %205 : i32 to index
    %207 = memref.load %arg3[%206] : memref<324xf32, #tpu.memory_space<smem>>
    %208 = vector.broadcast %207 : f32 to vector<16x16xf32>
    %209 = arith.mulf %203, %208 : vector<16x16xf32>
    %210 = arith.addf %202, %209 : vector<16x16xf32>
    %c2_89 = arith.constant 2 : index
    %c7_90 = arith.constant 7 : index
    %211 = vector.load %arg6[%c2_89, %c7_90] : memref<24x24xf32, #tpu.memory_space<vmem>>, vector<16x16xf32>
    %c18_i32_91 = arith.constant 18 : i32
    %212 = arith.addi %7, %c18_i32_91 : i32
    %c7_i32_92 = arith.constant 7 : i32
    %213 = arith.addi %212, %c7_i32_92 : i32
    %214 = arith.index_cast %213 : i32 to index
    %215 = memref.load %arg3[%214] : memref<324xf32, #tpu.memory_space<smem>>
    %216 = vector.broadcast %215 : f32 to vector<16x16xf32>
    %217 = arith.mulf %211, %216 : vector<16x16xf32>
    %218 = arith.addf %210, %217 : vector<16x16xf32>
    %c2_93 = arith.constant 2 : index
    %c8_94 = arith.constant 8 : index
    %219 = vector.load %arg6[%c2_93, %c8_94] : memref<24x24xf32, #tpu.memory_space<vmem>>, vector<16x16xf32>
    %c18_i32_95 = arith.constant 18 : i32
    %220 = arith.addi %7, %c18_i32_95 : i32
    %c8_i32_96 = arith.constant 8 : i32
    %221 = arith.addi %220, %c8_i32_96 : i32
    %222 = arith.index_cast %221 : i32 to index
    %223 = memref.load %arg3[%222] : memref<324xf32, #tpu.memory_space<smem>>
    %224 = vector.broadcast %223 : f32 to vector<16x16xf32>
    %225 = arith.mulf %219, %224 : vector<16x16xf32>
    %226 = arith.addf %218, %225 : vector<16x16xf32>
    %c3_97 = arith.constant 3 : index
    %c0_98 = arith.constant 0 : index
    %227 = vector.load %arg6[%c3_97, %c0_98] : memref<24x24xf32, #tpu.memory_space<vmem>>, vector<16x16xf32>
    %c27_i32 = arith.constant 27 : i32
    %228 = arith.addi %7, %c27_i32 : i32
    %c0_i32_99 = arith.constant 0 : i32
    %229 = arith.addi %228, %c0_i32_99 : i32
    %230 = arith.index_cast %229 : i32 to index
    %231 = memref.load %arg3[%230] : memref<324xf32, #tpu.memory_space<smem>>
    %232 = vector.broadcast %231 : f32 to vector<16x16xf32>
    %233 = arith.mulf %227, %232 : vector<16x16xf32>
    %234 = arith.addf %226, %233 : vector<16x16xf32>
    %c3_100 = arith.constant 3 : index
    %c1_101 = arith.constant 1 : index
    %235 = vector.load %arg6[%c3_100, %c1_101] : memref<24x24xf32, #tpu.memory_space<vmem>>, vector<16x16xf32>
    %c27_i32_102 = arith.constant 27 : i32
    %236 = arith.addi %7, %c27_i32_102 : i32
    %c1_i32_103 = arith.constant 1 : i32
    %237 = arith.addi %236, %c1_i32_103 : i32
    %238 = arith.index_cast %237 : i32 to index
    %239 = memref.load %arg3[%238] : memref<324xf32, #tpu.memory_space<smem>>
    %240 = vector.broadcast %239 : f32 to vector<16x16xf32>
    %241 = arith.mulf %235, %240 : vector<16x16xf32>
    %242 = arith.addf %234, %241 : vector<16x16xf32>
    %c3_104 = arith.constant 3 : index
    %c2_105 = arith.constant 2 : index
    %243 = vector.load %arg6[%c3_104, %c2_105] : memref<24x24xf32, #tpu.memory_space<vmem>>, vector<16x16xf32>
    %c27_i32_106 = arith.constant 27 : i32
    %244 = arith.addi %7, %c27_i32_106 : i32
    %c2_i32_107 = arith.constant 2 : i32
    %245 = arith.addi %244, %c2_i32_107 : i32
    %246 = arith.index_cast %245 : i32 to index
    %247 = memref.load %arg3[%246] : memref<324xf32, #tpu.memory_space<smem>>
    %248 = vector.broadcast %247 : f32 to vector<16x16xf32>
    %249 = arith.mulf %243, %248 : vector<16x16xf32>
    %250 = arith.addf %242, %249 : vector<16x16xf32>
    %c3_108 = arith.constant 3 : index
    %c3_109 = arith.constant 3 : index
    %251 = vector.load %arg6[%c3_108, %c3_109] : memref<24x24xf32, #tpu.memory_space<vmem>>, vector<16x16xf32>
    %c27_i32_110 = arith.constant 27 : i32
    %252 = arith.addi %7, %c27_i32_110 : i32
    %c3_i32_111 = arith.constant 3 : i32
    %253 = arith.addi %252, %c3_i32_111 : i32
    %254 = arith.index_cast %253 : i32 to index
    %255 = memref.load %arg3[%254] : memref<324xf32, #tpu.memory_space<smem>>
    %256 = vector.broadcast %255 : f32 to vector<16x16xf32>
    %257 = arith.mulf %251, %256 : vector<16x16xf32>
    %258 = arith.addf %250, %257 : vector<16x16xf32>
    %c3_112 = arith.constant 3 : index
    %c4_113 = arith.constant 4 : index
    %259 = vector.load %arg6[%c3_112, %c4_113] : memref<24x24xf32, #tpu.memory_space<vmem>>, vector<16x16xf32>
    %c27_i32_114 = arith.constant 27 : i32
    %260 = arith.addi %7, %c27_i32_114 : i32
    %c4_i32_115 = arith.constant 4 : i32
    %261 = arith.addi %260, %c4_i32_115 : i32
    %262 = arith.index_cast %261 : i32 to index
    %263 = memref.load %arg3[%262] : memref<324xf32, #tpu.memory_space<smem>>
    %264 = vector.broadcast %263 : f32 to vector<16x16xf32>
    %265 = arith.mulf %259, %264 : vector<16x16xf32>
    %266 = arith.addf %258, %265 : vector<16x16xf32>
    %c3_116 = arith.constant 3 : index
    %c5_117 = arith.constant 5 : index
    %267 = vector.load %arg6[%c3_116, %c5_117] : memref<24x24xf32, #tpu.memory_space<vmem>>, vector<16x16xf32>
    %c27_i32_118 = arith.constant 27 : i32
    %268 = arith.addi %7, %c27_i32_118 : i32
    %c5_i32_119 = arith.constant 5 : i32
    %269 = arith.addi %268, %c5_i32_119 : i32
    %270 = arith.index_cast %269 : i32 to index
    %271 = memref.load %arg3[%270] : memref<324xf32, #tpu.memory_space<smem>>
    %272 = vector.broadcast %271 : f32 to vector<16x16xf32>
    %273 = arith.mulf %267, %272 : vector<16x16xf32>
    %274 = arith.addf %266, %273 : vector<16x16xf32>
    %c3_120 = arith.constant 3 : index
    %c6_121 = arith.constant 6 : index
    %275 = vector.load %arg6[%c3_120, %c6_121] : memref<24x24xf32, #tpu.memory_space<vmem>>, vector<16x16xf32>
    %c27_i32_122 = arith.constant 27 : i32
    %276 = arith.addi %7, %c27_i32_122 : i32
    %c6_i32_123 = arith.constant 6 : i32
    %277 = arith.addi %276, %c6_i32_123 : i32
    %278 = arith.index_cast %277 : i32 to index
    %279 = memref.load %arg3[%278] : memref<324xf32, #tpu.memory_space<smem>>
    %280 = vector.broadcast %279 : f32 to vector<16x16xf32>
    %281 = arith.mulf %275, %280 : vector<16x16xf32>
    %282 = arith.addf %274, %281 : vector<16x16xf32>
    %c3_124 = arith.constant 3 : index
    %c7_125 = arith.constant 7 : index
    %283 = vector.load %arg6[%c3_124, %c7_125] : memref<24x24xf32, #tpu.memory_space<vmem>>, vector<16x16xf32>
    %c27_i32_126 = arith.constant 27 : i32
    %284 = arith.addi %7, %c27_i32_126 : i32
    %c7_i32_127 = arith.constant 7 : i32
    %285 = arith.addi %284, %c7_i32_127 : i32
    %286 = arith.index_cast %285 : i32 to index
    %287 = memref.load %arg3[%286] : memref<324xf32, #tpu.memory_space<smem>>
    %288 = vector.broadcast %287 : f32 to vector<16x16xf32>
    %289 = arith.mulf %283, %288 : vector<16x16xf32>
    %290 = arith.addf %282, %289 : vector<16x16xf32>
    %c3_128 = arith.constant 3 : index
    %c8_129 = arith.constant 8 : index
    %291 = vector.load %arg6[%c3_128, %c8_129] : memref<24x24xf32, #tpu.memory_space<vmem>>, vector<16x16xf32>
    %c27_i32_130 = arith.constant 27 : i32
    %292 = arith.addi %7, %c27_i32_130 : i32
    %c8_i32_131 = arith.constant 8 : i32
    %293 = arith.addi %292, %c8_i32_131 : i32
    %294 = arith.index_cast %293 : i32 to index
    %295 = memref.load %arg3[%294] : memref<324xf32, #tpu.memory_space<smem>>
    %296 = vector.broadcast %295 : f32 to vector<16x16xf32>
    %297 = arith.mulf %291, %296 : vector<16x16xf32>
    %298 = arith.addf %290, %297 : vector<16x16xf32>
    %c4_132 = arith.constant 4 : index
    %c0_133 = arith.constant 0 : index
    %299 = vector.load %arg6[%c4_132, %c0_133] : memref<24x24xf32, #tpu.memory_space<vmem>>, vector<16x16xf32>
    %c36_i32 = arith.constant 36 : i32
    %300 = arith.addi %7, %c36_i32 : i32
    %c0_i32_134 = arith.constant 0 : i32
    %301 = arith.addi %300, %c0_i32_134 : i32
    %302 = arith.index_cast %301 : i32 to index
    %303 = memref.load %arg3[%302] : memref<324xf32, #tpu.memory_space<smem>>
    %304 = vector.broadcast %303 : f32 to vector<16x16xf32>
    %305 = arith.mulf %299, %304 : vector<16x16xf32>
    %306 = arith.addf %298, %305 : vector<16x16xf32>
    %c4_135 = arith.constant 4 : index
    %c1_136 = arith.constant 1 : index
    %307 = vector.load %arg6[%c4_135, %c1_136] : memref<24x24xf32, #tpu.memory_space<vmem>>, vector<16x16xf32>
    %c36_i32_137 = arith.constant 36 : i32
    %308 = arith.addi %7, %c36_i32_137 : i32
    %c1_i32_138 = arith.constant 1 : i32
    %309 = arith.addi %308, %c1_i32_138 : i32
    %310 = arith.index_cast %309 : i32 to index
    %311 = memref.load %arg3[%310] : memref<324xf32, #tpu.memory_space<smem>>
    %312 = vector.broadcast %311 : f32 to vector<16x16xf32>
    %313 = arith.mulf %307, %312 : vector<16x16xf32>
    %314 = arith.addf %306, %313 : vector<16x16xf32>
    %c4_139 = arith.constant 4 : index
    %c2_140 = arith.constant 2 : index
    %315 = vector.load %arg6[%c4_139, %c2_140] : memref<24x24xf32, #tpu.memory_space<vmem>>, vector<16x16xf32>
    %c36_i32_141 = arith.constant 36 : i32
    %316 = arith.addi %7, %c36_i32_141 : i32
    %c2_i32_142 = arith.constant 2 : i32
    %317 = arith.addi %316, %c2_i32_142 : i32
    %318 = arith.index_cast %317 : i32 to index
    %319 = memref.load %arg3[%318] : memref<324xf32, #tpu.memory_space<smem>>
    %320 = vector.broadcast %319 : f32 to vector<16x16xf32>
    %321 = arith.mulf %315, %320 : vector<16x16xf32>
    %322 = arith.addf %314, %321 : vector<16x16xf32>
    %c4_143 = arith.constant 4 : index
    %c3_144 = arith.constant 3 : index
    %323 = vector.load %arg6[%c4_143, %c3_144] : memref<24x24xf32, #tpu.memory_space<vmem>>, vector<16x16xf32>
    %c36_i32_145 = arith.constant 36 : i32
    %324 = arith.addi %7, %c36_i32_145 : i32
    %c3_i32_146 = arith.constant 3 : i32
    %325 = arith.addi %324, %c3_i32_146 : i32
    %326 = arith.index_cast %325 : i32 to index
    %327 = memref.load %arg3[%326] : memref<324xf32, #tpu.memory_space<smem>>
    %328 = vector.broadcast %327 : f32 to vector<16x16xf32>
    %329 = arith.mulf %323, %328 : vector<16x16xf32>
    %330 = arith.addf %322, %329 : vector<16x16xf32>
    %c4_147 = arith.constant 4 : index
    %c4_148 = arith.constant 4 : index
    %331 = vector.load %arg6[%c4_147, %c4_148] : memref<24x24xf32, #tpu.memory_space<vmem>>, vector<16x16xf32>
    %c36_i32_149 = arith.constant 36 : i32
    %332 = arith.addi %7, %c36_i32_149 : i32
    %c4_i32_150 = arith.constant 4 : i32
    %333 = arith.addi %332, %c4_i32_150 : i32
    %334 = arith.index_cast %333 : i32 to index
    %335 = memref.load %arg3[%334] : memref<324xf32, #tpu.memory_space<smem>>
    %336 = vector.broadcast %335 : f32 to vector<16x16xf32>
    %337 = arith.mulf %331, %336 : vector<16x16xf32>
    %338 = arith.addf %330, %337 : vector<16x16xf32>
    %c4_151 = arith.constant 4 : index
    %c5_152 = arith.constant 5 : index
    %339 = vector.load %arg6[%c4_151, %c5_152] : memref<24x24xf32, #tpu.memory_space<vmem>>, vector<16x16xf32>
    %c36_i32_153 = arith.constant 36 : i32
    %340 = arith.addi %7, %c36_i32_153 : i32
    %c5_i32_154 = arith.constant 5 : i32
    %341 = arith.addi %340, %c5_i32_154 : i32
    %342 = arith.index_cast %341 : i32 to index
    %343 = memref.load %arg3[%342] : memref<324xf32, #tpu.memory_space<smem>>
    %344 = vector.broadcast %343 : f32 to vector<16x16xf32>
    %345 = arith.mulf %339, %344 : vector<16x16xf32>
    %346 = arith.addf %338, %345 : vector<16x16xf32>
    %c4_155 = arith.constant 4 : index
    %c6_156 = arith.constant 6 : index
    %347 = vector.load %arg6[%c4_155, %c6_156] : memref<24x24xf32, #tpu.memory_space<vmem>>, vector<16x16xf32>
    %c36_i32_157 = arith.constant 36 : i32
    %348 = arith.addi %7, %c36_i32_157 : i32
    %c6_i32_158 = arith.constant 6 : i32
    %349 = arith.addi %348, %c6_i32_158 : i32
    %350 = arith.index_cast %349 : i32 to index
    %351 = memref.load %arg3[%350] : memref<324xf32, #tpu.memory_space<smem>>
    %352 = vector.broadcast %351 : f32 to vector<16x16xf32>
    %353 = arith.mulf %347, %352 : vector<16x16xf32>
    %354 = arith.addf %346, %353 : vector<16x16xf32>
    %c4_159 = arith.constant 4 : index
    %c7_160 = arith.constant 7 : index
    %355 = vector.load %arg6[%c4_159, %c7_160] : memref<24x24xf32, #tpu.memory_space<vmem>>, vector<16x16xf32>
    %c36_i32_161 = arith.constant 36 : i32
    %356 = arith.addi %7, %c36_i32_161 : i32
    %c7_i32_162 = arith.constant 7 : i32
    %357 = arith.addi %356, %c7_i32_162 : i32
    %358 = arith.index_cast %357 : i32 to index
    %359 = memref.load %arg3[%358] : memref<324xf32, #tpu.memory_space<smem>>
    %360 = vector.broadcast %359 : f32 to vector<16x16xf32>
    %361 = arith.mulf %355, %360 : vector<16x16xf32>
    %362 = arith.addf %354, %361 : vector<16x16xf32>
    %c4_163 = arith.constant 4 : index
    %c8_164 = arith.constant 8 : index
    %363 = vector.load %arg6[%c4_163, %c8_164] : memref<24x24xf32, #tpu.memory_space<vmem>>, vector<16x16xf32>
    %c36_i32_165 = arith.constant 36 : i32
    %364 = arith.addi %7, %c36_i32_165 : i32
    %c8_i32_166 = arith.constant 8 : i32
    %365 = arith.addi %364, %c8_i32_166 : i32
    %366 = arith.index_cast %365 : i32 to index
    %367 = memref.load %arg3[%366] : memref<324xf32, #tpu.memory_space<smem>>
    %368 = vector.broadcast %367 : f32 to vector<16x16xf32>
    %369 = arith.mulf %363, %368 : vector<16x16xf32>
    %370 = arith.addf %362, %369 : vector<16x16xf32>
    %c5_167 = arith.constant 5 : index
    %c0_168 = arith.constant 0 : index
    %371 = vector.load %arg6[%c5_167, %c0_168] : memref<24x24xf32, #tpu.memory_space<vmem>>, vector<16x16xf32>
    %c45_i32 = arith.constant 45 : i32
    %372 = arith.addi %7, %c45_i32 : i32
    %c0_i32_169 = arith.constant 0 : i32
    %373 = arith.addi %372, %c0_i32_169 : i32
    %374 = arith.index_cast %373 : i32 to index
    %375 = memref.load %arg3[%374] : memref<324xf32, #tpu.memory_space<smem>>
    %376 = vector.broadcast %375 : f32 to vector<16x16xf32>
    %377 = arith.mulf %371, %376 : vector<16x16xf32>
    %378 = arith.addf %370, %377 : vector<16x16xf32>
    %c5_170 = arith.constant 5 : index
    %c1_171 = arith.constant 1 : index
    %379 = vector.load %arg6[%c5_170, %c1_171] : memref<24x24xf32, #tpu.memory_space<vmem>>, vector<16x16xf32>
    %c45_i32_172 = arith.constant 45 : i32
    %380 = arith.addi %7, %c45_i32_172 : i32
    %c1_i32_173 = arith.constant 1 : i32
    %381 = arith.addi %380, %c1_i32_173 : i32
    %382 = arith.index_cast %381 : i32 to index
    %383 = memref.load %arg3[%382] : memref<324xf32, #tpu.memory_space<smem>>
    %384 = vector.broadcast %383 : f32 to vector<16x16xf32>
    %385 = arith.mulf %379, %384 : vector<16x16xf32>
    %386 = arith.addf %378, %385 : vector<16x16xf32>
    %c5_174 = arith.constant 5 : index
    %c2_175 = arith.constant 2 : index
    %387 = vector.load %arg6[%c5_174, %c2_175] : memref<24x24xf32, #tpu.memory_space<vmem>>, vector<16x16xf32>
    %c45_i32_176 = arith.constant 45 : i32
    %388 = arith.addi %7, %c45_i32_176 : i32
    %c2_i32_177 = arith.constant 2 : i32
    %389 = arith.addi %388, %c2_i32_177 : i32
    %390 = arith.index_cast %389 : i32 to index
    %391 = memref.load %arg3[%390] : memref<324xf32, #tpu.memory_space<smem>>
    %392 = vector.broadcast %391 : f32 to vector<16x16xf32>
    %393 = arith.mulf %387, %392 : vector<16x16xf32>
    %394 = arith.addf %386, %393 : vector<16x16xf32>
    %c5_178 = arith.constant 5 : index
    %c3_179 = arith.constant 3 : index
    %395 = vector.load %arg6[%c5_178, %c3_179] : memref<24x24xf32, #tpu.memory_space<vmem>>, vector<16x16xf32>
    %c45_i32_180 = arith.constant 45 : i32
    %396 = arith.addi %7, %c45_i32_180 : i32
    %c3_i32_181 = arith.constant 3 : i32
    %397 = arith.addi %396, %c3_i32_181 : i32
    %398 = arith.index_cast %397 : i32 to index
    %399 = memref.load %arg3[%398] : memref<324xf32, #tpu.memory_space<smem>>
    %400 = vector.broadcast %399 : f32 to vector<16x16xf32>
    %401 = arith.mulf %395, %400 : vector<16x16xf32>
    %402 = arith.addf %394, %401 : vector<16x16xf32>
    %c5_182 = arith.constant 5 : index
    %c4_183 = arith.constant 4 : index
    %403 = vector.load %arg6[%c5_182, %c4_183] : memref<24x24xf32, #tpu.memory_space<vmem>>, vector<16x16xf32>
    %c45_i32_184 = arith.constant 45 : i32
    %404 = arith.addi %7, %c45_i32_184 : i32
    %c4_i32_185 = arith.constant 4 : i32
    %405 = arith.addi %404, %c4_i32_185 : i32
    %406 = arith.index_cast %405 : i32 to index
    %407 = memref.load %arg3[%406] : memref<324xf32, #tpu.memory_space<smem>>
    %408 = vector.broadcast %407 : f32 to vector<16x16xf32>
    %409 = arith.mulf %403, %408 : vector<16x16xf32>
    %410 = arith.addf %402, %409 : vector<16x16xf32>
    %c5_186 = arith.constant 5 : index
    %c5_187 = arith.constant 5 : index
    %411 = vector.load %arg6[%c5_186, %c5_187] : memref<24x24xf32, #tpu.memory_space<vmem>>, vector<16x16xf32>
    %c45_i32_188 = arith.constant 45 : i32
    %412 = arith.addi %7, %c45_i32_188 : i32
    %c5_i32_189 = arith.constant 5 : i32
    %413 = arith.addi %412, %c5_i32_189 : i32
    %414 = arith.index_cast %413 : i32 to index
    %415 = memref.load %arg3[%414] : memref<324xf32, #tpu.memory_space<smem>>
    %416 = vector.broadcast %415 : f32 to vector<16x16xf32>
    %417 = arith.mulf %411, %416 : vector<16x16xf32>
    %418 = arith.addf %410, %417 : vector<16x16xf32>
    %c5_190 = arith.constant 5 : index
    %c6_191 = arith.constant 6 : index
    %419 = vector.load %arg6[%c5_190, %c6_191] : memref<24x24xf32, #tpu.memory_space<vmem>>, vector<16x16xf32>
    %c45_i32_192 = arith.constant 45 : i32
    %420 = arith.addi %7, %c45_i32_192 : i32
    %c6_i32_193 = arith.constant 6 : i32
    %421 = arith.addi %420, %c6_i32_193 : i32
    %422 = arith.index_cast %421 : i32 to index
    %423 = memref.load %arg3[%422] : memref<324xf32, #tpu.memory_space<smem>>
    %424 = vector.broadcast %423 : f32 to vector<16x16xf32>
    %425 = arith.mulf %419, %424 : vector<16x16xf32>
    %426 = arith.addf %418, %425 : vector<16x16xf32>
    %c5_194 = arith.constant 5 : index
    %c7_195 = arith.constant 7 : index
    %427 = vector.load %arg6[%c5_194, %c7_195] : memref<24x24xf32, #tpu.memory_space<vmem>>, vector<16x16xf32>
    %c45_i32_196 = arith.constant 45 : i32
    %428 = arith.addi %7, %c45_i32_196 : i32
    %c7_i32_197 = arith.constant 7 : i32
    %429 = arith.addi %428, %c7_i32_197 : i32
    %430 = arith.index_cast %429 : i32 to index
    %431 = memref.load %arg3[%430] : memref<324xf32, #tpu.memory_space<smem>>
    %432 = vector.broadcast %431 : f32 to vector<16x16xf32>
    %433 = arith.mulf %427, %432 : vector<16x16xf32>
    %434 = arith.addf %426, %433 : vector<16x16xf32>
    %c5_198 = arith.constant 5 : index
    %c8_199 = arith.constant 8 : index
    %435 = vector.load %arg6[%c5_198, %c8_199] : memref<24x24xf32, #tpu.memory_space<vmem>>, vector<16x16xf32>
    %c45_i32_200 = arith.constant 45 : i32
    %436 = arith.addi %7, %c45_i32_200 : i32
    %c8_i32_201 = arith.constant 8 : i32
    %437 = arith.addi %436, %c8_i32_201 : i32
    %438 = arith.index_cast %437 : i32 to index
    %439 = memref.load %arg3[%438] : memref<324xf32, #tpu.memory_space<smem>>
    %440 = vector.broadcast %439 : f32 to vector<16x16xf32>
    %441 = arith.mulf %435, %440 : vector<16x16xf32>
    %442 = arith.addf %434, %441 : vector<16x16xf32>
    %c6_202 = arith.constant 6 : index
    %c0_203 = arith.constant 0 : index
    %443 = vector.load %arg6[%c6_202, %c0_203] : memref<24x24xf32, #tpu.memory_space<vmem>>, vector<16x16xf32>
    %c54_i32 = arith.constant 54 : i32
    %444 = arith.addi %7, %c54_i32 : i32
    %c0_i32_204 = arith.constant 0 : i32
    %445 = arith.addi %444, %c0_i32_204 : i32
    %446 = arith.index_cast %445 : i32 to index
    %447 = memref.load %arg3[%446] : memref<324xf32, #tpu.memory_space<smem>>
    %448 = vector.broadcast %447 : f32 to vector<16x16xf32>
    %449 = arith.mulf %443, %448 : vector<16x16xf32>
    %450 = arith.addf %442, %449 : vector<16x16xf32>
    %c6_205 = arith.constant 6 : index
    %c1_206 = arith.constant 1 : index
    %451 = vector.load %arg6[%c6_205, %c1_206] : memref<24x24xf32, #tpu.memory_space<vmem>>, vector<16x16xf32>
    %c54_i32_207 = arith.constant 54 : i32
    %452 = arith.addi %7, %c54_i32_207 : i32
    %c1_i32_208 = arith.constant 1 : i32
    %453 = arith.addi %452, %c1_i32_208 : i32
    %454 = arith.index_cast %453 : i32 to index
    %455 = memref.load %arg3[%454] : memref<324xf32, #tpu.memory_space<smem>>
    %456 = vector.broadcast %455 : f32 to vector<16x16xf32>
    %457 = arith.mulf %451, %456 : vector<16x16xf32>
    %458 = arith.addf %450, %457 : vector<16x16xf32>
    %c6_209 = arith.constant 6 : index
    %c2_210 = arith.constant 2 : index
    %459 = vector.load %arg6[%c6_209, %c2_210] : memref<24x24xf32, #tpu.memory_space<vmem>>, vector<16x16xf32>
    %c54_i32_211 = arith.constant 54 : i32
    %460 = arith.addi %7, %c54_i32_211 : i32
    %c2_i32_212 = arith.constant 2 : i32
    %461 = arith.addi %460, %c2_i32_212 : i32
    %462 = arith.index_cast %461 : i32 to index
    %463 = memref.load %arg3[%462] : memref<324xf32, #tpu.memory_space<smem>>
    %464 = vector.broadcast %463 : f32 to vector<16x16xf32>
    %465 = arith.mulf %459, %464 : vector<16x16xf32>
    %466 = arith.addf %458, %465 : vector<16x16xf32>
    %c6_213 = arith.constant 6 : index
    %c3_214 = arith.constant 3 : index
    %467 = vector.load %arg6[%c6_213, %c3_214] : memref<24x24xf32, #tpu.memory_space<vmem>>, vector<16x16xf32>
    %c54_i32_215 = arith.constant 54 : i32
    %468 = arith.addi %7, %c54_i32_215 : i32
    %c3_i32_216 = arith.constant 3 : i32
    %469 = arith.addi %468, %c3_i32_216 : i32
    %470 = arith.index_cast %469 : i32 to index
    %471 = memref.load %arg3[%470] : memref<324xf32, #tpu.memory_space<smem>>
    %472 = vector.broadcast %471 : f32 to vector<16x16xf32>
    %473 = arith.mulf %467, %472 : vector<16x16xf32>
    %474 = arith.addf %466, %473 : vector<16x16xf32>
    %c6_217 = arith.constant 6 : index
    %c4_218 = arith.constant 4 : index
    %475 = vector.load %arg6[%c6_217, %c4_218] : memref<24x24xf32, #tpu.memory_space<vmem>>, vector<16x16xf32>
    %c54_i32_219 = arith.constant 54 : i32
    %476 = arith.addi %7, %c54_i32_219 : i32
    %c4_i32_220 = arith.constant 4 : i32
    %477 = arith.addi %476, %c4_i32_220 : i32
    %478 = arith.index_cast %477 : i32 to index
    %479 = memref.load %arg3[%478] : memref<324xf32, #tpu.memory_space<smem>>
    %480 = vector.broadcast %479 : f32 to vector<16x16xf32>
    %481 = arith.mulf %475, %480 : vector<16x16xf32>
    %482 = arith.addf %474, %481 : vector<16x16xf32>
    %c6_221 = arith.constant 6 : index
    %c5_222 = arith.constant 5 : index
    %483 = vector.load %arg6[%c6_221, %c5_222] : memref<24x24xf32, #tpu.memory_space<vmem>>, vector<16x16xf32>
    %c54_i32_223 = arith.constant 54 : i32
    %484 = arith.addi %7, %c54_i32_223 : i32
    %c5_i32_224 = arith.constant 5 : i32
    %485 = arith.addi %484, %c5_i32_224 : i32
    %486 = arith.index_cast %485 : i32 to index
    %487 = memref.load %arg3[%486] : memref<324xf32, #tpu.memory_space<smem>>
    %488 = vector.broadcast %487 : f32 to vector<16x16xf32>
    %489 = arith.mulf %483, %488 : vector<16x16xf32>
    %490 = arith.addf %482, %489 : vector<16x16xf32>
    %c6_225 = arith.constant 6 : index
    %c6_226 = arith.constant 6 : index
    %491 = vector.load %arg6[%c6_225, %c6_226] : memref<24x24xf32, #tpu.memory_space<vmem>>, vector<16x16xf32>
    %c54_i32_227 = arith.constant 54 : i32
    %492 = arith.addi %7, %c54_i32_227 : i32
    %c6_i32_228 = arith.constant 6 : i32
    %493 = arith.addi %492, %c6_i32_228 : i32
    %494 = arith.index_cast %493 : i32 to index
    %495 = memref.load %arg3[%494] : memref<324xf32, #tpu.memory_space<smem>>
    %496 = vector.broadcast %495 : f32 to vector<16x16xf32>
    %497 = arith.mulf %491, %496 : vector<16x16xf32>
    %498 = arith.addf %490, %497 : vector<16x16xf32>
    %c6_229 = arith.constant 6 : index
    %c7_230 = arith.constant 7 : index
    %499 = vector.load %arg6[%c6_229, %c7_230] : memref<24x24xf32, #tpu.memory_space<vmem>>, vector<16x16xf32>
    %c54_i32_231 = arith.constant 54 : i32
    %500 = arith.addi %7, %c54_i32_231 : i32
    %c7_i32_232 = arith.constant 7 : i32
    %501 = arith.addi %500, %c7_i32_232 : i32
    %502 = arith.index_cast %501 : i32 to index
    %503 = memref.load %arg3[%502] : memref<324xf32, #tpu.memory_space<smem>>
    %504 = vector.broadcast %503 : f32 to vector<16x16xf32>
    %505 = arith.mulf %499, %504 : vector<16x16xf32>
    %506 = arith.addf %498, %505 : vector<16x16xf32>
    %c6_233 = arith.constant 6 : index
    %c8_234 = arith.constant 8 : index
    %507 = vector.load %arg6[%c6_233, %c8_234] : memref<24x24xf32, #tpu.memory_space<vmem>>, vector<16x16xf32>
    %c54_i32_235 = arith.constant 54 : i32
    %508 = arith.addi %7, %c54_i32_235 : i32
    %c8_i32_236 = arith.constant 8 : i32
    %509 = arith.addi %508, %c8_i32_236 : i32
    %510 = arith.index_cast %509 : i32 to index
    %511 = memref.load %arg3[%510] : memref<324xf32, #tpu.memory_space<smem>>
    %512 = vector.broadcast %511 : f32 to vector<16x16xf32>
    %513 = arith.mulf %507, %512 : vector<16x16xf32>
    %514 = arith.addf %506, %513 : vector<16x16xf32>
    %c7_237 = arith.constant 7 : index
    %c0_238 = arith.constant 0 : index
    %515 = vector.load %arg6[%c7_237, %c0_238] : memref<24x24xf32, #tpu.memory_space<vmem>>, vector<16x16xf32>
    %c63_i32 = arith.constant 63 : i32
    %516 = arith.addi %7, %c63_i32 : i32
    %c0_i32_239 = arith.constant 0 : i32
    %517 = arith.addi %516, %c0_i32_239 : i32
    %518 = arith.index_cast %517 : i32 to index
    %519 = memref.load %arg3[%518] : memref<324xf32, #tpu.memory_space<smem>>
    %520 = vector.broadcast %519 : f32 to vector<16x16xf32>
    %521 = arith.mulf %515, %520 : vector<16x16xf32>
    %522 = arith.addf %514, %521 : vector<16x16xf32>
    %c7_240 = arith.constant 7 : index
    %c1_241 = arith.constant 1 : index
    %523 = vector.load %arg6[%c7_240, %c1_241] : memref<24x24xf32, #tpu.memory_space<vmem>>, vector<16x16xf32>
    %c63_i32_242 = arith.constant 63 : i32
    %524 = arith.addi %7, %c63_i32_242 : i32
    %c1_i32_243 = arith.constant 1 : i32
    %525 = arith.addi %524, %c1_i32_243 : i32
    %526 = arith.index_cast %525 : i32 to index
    %527 = memref.load %arg3[%526] : memref<324xf32, #tpu.memory_space<smem>>
    %528 = vector.broadcast %527 : f32 to vector<16x16xf32>
    %529 = arith.mulf %523, %528 : vector<16x16xf32>
    %530 = arith.addf %522, %529 : vector<16x16xf32>
    %c7_244 = arith.constant 7 : index
    %c2_245 = arith.constant 2 : index
    %531 = vector.load %arg6[%c7_244, %c2_245] : memref<24x24xf32, #tpu.memory_space<vmem>>, vector<16x16xf32>
    %c63_i32_246 = arith.constant 63 : i32
    %532 = arith.addi %7, %c63_i32_246 : i32
    %c2_i32_247 = arith.constant 2 : i32
    %533 = arith.addi %532, %c2_i32_247 : i32
    %534 = arith.index_cast %533 : i32 to index
    %535 = memref.load %arg3[%534] : memref<324xf32, #tpu.memory_space<smem>>
    %536 = vector.broadcast %535 : f32 to vector<16x16xf32>
    %537 = arith.mulf %531, %536 : vector<16x16xf32>
    %538 = arith.addf %530, %537 : vector<16x16xf32>
    %c7_248 = arith.constant 7 : index
    %c3_249 = arith.constant 3 : index
    %539 = vector.load %arg6[%c7_248, %c3_249] : memref<24x24xf32, #tpu.memory_space<vmem>>, vector<16x16xf32>
    %c63_i32_250 = arith.constant 63 : i32
    %540 = arith.addi %7, %c63_i32_250 : i32
    %c3_i32_251 = arith.constant 3 : i32
    %541 = arith.addi %540, %c3_i32_251 : i32
    %542 = arith.index_cast %541 : i32 to index
    %543 = memref.load %arg3[%542] : memref<324xf32, #tpu.memory_space<smem>>
    %544 = vector.broadcast %543 : f32 to vector<16x16xf32>
    %545 = arith.mulf %539, %544 : vector<16x16xf32>
    %546 = arith.addf %538, %545 : vector<16x16xf32>
    %c7_252 = arith.constant 7 : index
    %c4_253 = arith.constant 4 : index
    %547 = vector.load %arg6[%c7_252, %c4_253] : memref<24x24xf32, #tpu.memory_space<vmem>>, vector<16x16xf32>
    %c63_i32_254 = arith.constant 63 : i32
    %548 = arith.addi %7, %c63_i32_254 : i32
    %c4_i32_255 = arith.constant 4 : i32
    %549 = arith.addi %548, %c4_i32_255 : i32
    %550 = arith.index_cast %549 : i32 to index
    %551 = memref.load %arg3[%550] : memref<324xf32, #tpu.memory_space<smem>>
    %552 = vector.broadcast %551 : f32 to vector<16x16xf32>
    %553 = arith.mulf %547, %552 : vector<16x16xf32>
    %554 = arith.addf %546, %553 : vector<16x16xf32>
    %c7_256 = arith.constant 7 : index
    %c5_257 = arith.constant 5 : index
    %555 = vector.load %arg6[%c7_256, %c5_257] : memref<24x24xf32, #tpu.memory_space<vmem>>, vector<16x16xf32>
    %c63_i32_258 = arith.constant 63 : i32
    %556 = arith.addi %7, %c63_i32_258 : i32
    %c5_i32_259 = arith.constant 5 : i32
    %557 = arith.addi %556, %c5_i32_259 : i32
    %558 = arith.index_cast %557 : i32 to index
    %559 = memref.load %arg3[%558] : memref<324xf32, #tpu.memory_space<smem>>
    %560 = vector.broadcast %559 : f32 to vector<16x16xf32>
    %561 = arith.mulf %555, %560 : vector<16x16xf32>
    %562 = arith.addf %554, %561 : vector<16x16xf32>
    %c7_260 = arith.constant 7 : index
    %c6_261 = arith.constant 6 : index
    %563 = vector.load %arg6[%c7_260, %c6_261] : memref<24x24xf32, #tpu.memory_space<vmem>>, vector<16x16xf32>
    %c63_i32_262 = arith.constant 63 : i32
    %564 = arith.addi %7, %c63_i32_262 : i32
    %c6_i32_263 = arith.constant 6 : i32
    %565 = arith.addi %564, %c6_i32_263 : i32
    %566 = arith.index_cast %565 : i32 to index
    %567 = memref.load %arg3[%566] : memref<324xf32, #tpu.memory_space<smem>>
    %568 = vector.broadcast %567 : f32 to vector<16x16xf32>
    %569 = arith.mulf %563, %568 : vector<16x16xf32>
    %570 = arith.addf %562, %569 : vector<16x16xf32>
    %c7_264 = arith.constant 7 : index
    %c7_265 = arith.constant 7 : index
    %571 = vector.load %arg6[%c7_264, %c7_265] : memref<24x24xf32, #tpu.memory_space<vmem>>, vector<16x16xf32>
    %c63_i32_266 = arith.constant 63 : i32
    %572 = arith.addi %7, %c63_i32_266 : i32
    %c7_i32_267 = arith.constant 7 : i32
    %573 = arith.addi %572, %c7_i32_267 : i32
    %574 = arith.index_cast %573 : i32 to index
    %575 = memref.load %arg3[%574] : memref<324xf32, #tpu.memory_space<smem>>
    %576 = vector.broadcast %575 : f32 to vector<16x16xf32>
    %577 = arith.mulf %571, %576 : vector<16x16xf32>
    %578 = arith.addf %570, %577 : vector<16x16xf32>
    %c7_268 = arith.constant 7 : index
    %c8_269 = arith.constant 8 : index
    %579 = vector.load %arg6[%c7_268, %c8_269] : memref<24x24xf32, #tpu.memory_space<vmem>>, vector<16x16xf32>
    %c63_i32_270 = arith.constant 63 : i32
    %580 = arith.addi %7, %c63_i32_270 : i32
    %c8_i32_271 = arith.constant 8 : i32
    %581 = arith.addi %580, %c8_i32_271 : i32
    %582 = arith.index_cast %581 : i32 to index
    %583 = memref.load %arg3[%582] : memref<324xf32, #tpu.memory_space<smem>>
    %584 = vector.broadcast %583 : f32 to vector<16x16xf32>
    %585 = arith.mulf %579, %584 : vector<16x16xf32>
    %586 = arith.addf %578, %585 : vector<16x16xf32>
    %c8_272 = arith.constant 8 : index
    %c0_273 = arith.constant 0 : index
    %587 = vector.load %arg6[%c8_272, %c0_273] : memref<24x24xf32, #tpu.memory_space<vmem>>, vector<16x16xf32>
    %c72_i32 = arith.constant 72 : i32
    %588 = arith.addi %7, %c72_i32 : i32
    %c0_i32_274 = arith.constant 0 : i32
    %589 = arith.addi %588, %c0_i32_274 : i32
    %590 = arith.index_cast %589 : i32 to index
    %591 = memref.load %arg3[%590] : memref<324xf32, #tpu.memory_space<smem>>
    %592 = vector.broadcast %591 : f32 to vector<16x16xf32>
    %593 = arith.mulf %587, %592 : vector<16x16xf32>
    %594 = arith.addf %586, %593 : vector<16x16xf32>
    %c8_275 = arith.constant 8 : index
    %c1_276 = arith.constant 1 : index
    %595 = vector.load %arg6[%c8_275, %c1_276] : memref<24x24xf32, #tpu.memory_space<vmem>>, vector<16x16xf32>
    %c72_i32_277 = arith.constant 72 : i32
    %596 = arith.addi %7, %c72_i32_277 : i32
    %c1_i32_278 = arith.constant 1 : i32
    %597 = arith.addi %596, %c1_i32_278 : i32
    %598 = arith.index_cast %597 : i32 to index
    %599 = memref.load %arg3[%598] : memref<324xf32, #tpu.memory_space<smem>>
    %600 = vector.broadcast %599 : f32 to vector<16x16xf32>
    %601 = arith.mulf %595, %600 : vector<16x16xf32>
    %602 = arith.addf %594, %601 : vector<16x16xf32>
    %c8_279 = arith.constant 8 : index
    %c2_280 = arith.constant 2 : index
    %603 = vector.load %arg6[%c8_279, %c2_280] : memref<24x24xf32, #tpu.memory_space<vmem>>, vector<16x16xf32>
    %c72_i32_281 = arith.constant 72 : i32
    %604 = arith.addi %7, %c72_i32_281 : i32
    %c2_i32_282 = arith.constant 2 : i32
    %605 = arith.addi %604, %c2_i32_282 : i32
    %606 = arith.index_cast %605 : i32 to index
    %607 = memref.load %arg3[%606] : memref<324xf32, #tpu.memory_space<smem>>
    %608 = vector.broadcast %607 : f32 to vector<16x16xf32>
    %609 = arith.mulf %603, %608 : vector<16x16xf32>
    %610 = arith.addf %602, %609 : vector<16x16xf32>
    %c8_283 = arith.constant 8 : index
    %c3_284 = arith.constant 3 : index
    %611 = vector.load %arg6[%c8_283, %c3_284] : memref<24x24xf32, #tpu.memory_space<vmem>>, vector<16x16xf32>
    %c72_i32_285 = arith.constant 72 : i32
    %612 = arith.addi %7, %c72_i32_285 : i32
    %c3_i32_286 = arith.constant 3 : i32
    %613 = arith.addi %612, %c3_i32_286 : i32
    %614 = arith.index_cast %613 : i32 to index
    %615 = memref.load %arg3[%614] : memref<324xf32, #tpu.memory_space<smem>>
    %616 = vector.broadcast %615 : f32 to vector<16x16xf32>
    %617 = arith.mulf %611, %616 : vector<16x16xf32>
    %618 = arith.addf %610, %617 : vector<16x16xf32>
    %c8_287 = arith.constant 8 : index
    %c4_288 = arith.constant 4 : index
    %619 = vector.load %arg6[%c8_287, %c4_288] : memref<24x24xf32, #tpu.memory_space<vmem>>, vector<16x16xf32>
    %c72_i32_289 = arith.constant 72 : i32
    %620 = arith.addi %7, %c72_i32_289 : i32
    %c4_i32_290 = arith.constant 4 : i32
    %621 = arith.addi %620, %c4_i32_290 : i32
    %622 = arith.index_cast %621 : i32 to index
    %623 = memref.load %arg3[%622] : memref<324xf32, #tpu.memory_space<smem>>
    %624 = vector.broadcast %623 : f32 to vector<16x16xf32>
    %625 = arith.mulf %619, %624 : vector<16x16xf32>
    %626 = arith.addf %618, %625 : vector<16x16xf32>
    %c8_291 = arith.constant 8 : index
    %c5_292 = arith.constant 5 : index
    %627 = vector.load %arg6[%c8_291, %c5_292] : memref<24x24xf32, #tpu.memory_space<vmem>>, vector<16x16xf32>
    %c72_i32_293 = arith.constant 72 : i32
    %628 = arith.addi %7, %c72_i32_293 : i32
    %c5_i32_294 = arith.constant 5 : i32
    %629 = arith.addi %628, %c5_i32_294 : i32
    %630 = arith.index_cast %629 : i32 to index
    %631 = memref.load %arg3[%630] : memref<324xf32, #tpu.memory_space<smem>>
    %632 = vector.broadcast %631 : f32 to vector<16x16xf32>
    %633 = arith.mulf %627, %632 : vector<16x16xf32>
    %634 = arith.addf %626, %633 : vector<16x16xf32>
    %c8_295 = arith.constant 8 : index
    %c6_296 = arith.constant 6 : index
    %635 = vector.load %arg6[%c8_295, %c6_296] : memref<24x24xf32, #tpu.memory_space<vmem>>, vector<16x16xf32>
    %c72_i32_297 = arith.constant 72 : i32
    %636 = arith.addi %7, %c72_i32_297 : i32
    %c6_i32_298 = arith.constant 6 : i32
    %637 = arith.addi %636, %c6_i32_298 : i32
    %638 = arith.index_cast %637 : i32 to index
    %639 = memref.load %arg3[%638] : memref<324xf32, #tpu.memory_space<smem>>
    %640 = vector.broadcast %639 : f32 to vector<16x16xf32>
    %641 = arith.mulf %635, %640 : vector<16x16xf32>
    %642 = arith.addf %634, %641 : vector<16x16xf32>
    %c8_299 = arith.constant 8 : index
    %c7_300 = arith.constant 7 : index
    %643 = vector.load %arg6[%c8_299, %c7_300] : memref<24x24xf32, #tpu.memory_space<vmem>>, vector<16x16xf32>
    %c72_i32_301 = arith.constant 72 : i32
    %644 = arith.addi %7, %c72_i32_301 : i32
    %c7_i32_302 = arith.constant 7 : i32
    %645 = arith.addi %644, %c7_i32_302 : i32
    %646 = arith.index_cast %645 : i32 to index
    %647 = memref.load %arg3[%646] : memref<324xf32, #tpu.memory_space<smem>>
    %648 = vector.broadcast %647 : f32 to vector<16x16xf32>
    %649 = arith.mulf %643, %648 : vector<16x16xf32>
    %650 = arith.addf %642, %649 : vector<16x16xf32>
    %c8_303 = arith.constant 8 : index
    %c8_304 = arith.constant 8 : index
    %651 = vector.load %arg6[%c8_303, %c8_304] : memref<24x24xf32, #tpu.memory_space<vmem>>, vector<16x16xf32>
    %c72_i32_305 = arith.constant 72 : i32
    %652 = arith.addi %7, %c72_i32_305 : i32
    %c8_i32_306 = arith.constant 8 : i32
    %653 = arith.addi %652, %c8_i32_306 : i32
    %654 = arith.index_cast %653 : i32 to index
    %655 = memref.load %arg3[%654] : memref<324xf32, #tpu.memory_space<smem>>
    %656 = vector.broadcast %655 : f32 to vector<16x16xf32>
    %657 = arith.mulf %651, %656 : vector<16x16xf32>
    %658 = arith.addf %650, %657 : vector<16x16xf32>
    %659 = arith.mulf %658, %658 : vector<16x16xf32>
    %cst_307 = arith.constant 0.000000e+00 : f32
    %660 = vector.broadcast %cst_307 : f32 to vector<16x16xf32>
    %661 = arith.subf %660, %659 : vector<16x16xf32>
    %662 = math.exp %661 : vector<16x16xf32>
    %c0_308 = arith.constant 0 : index
    %c0_309 = arith.constant 0 : index
    %c0_310 = arith.constant 0 : index
    %c0_311 = arith.constant 0 : index
    %663 = vector.load %arg2[%c0_308, %c0_309, %c0_310, %c0_311] : memref<1x1x16x16xf32, #tpu.memory_space<vmem>>, vector<1x1x16x16xf32>
    %664 = vector.shape_cast %663 : vector<1x1x16x16xf32> to vector<16x16xf32>
    %665 = arith.mulf %662, %664 : vector<16x16xf32>
    %c0_312 = arith.constant 0 : index
    %c0_313 = arith.constant 0 : index
    %c0_314 = arith.constant 0 : index
    %c0_315 = arith.constant 0 : index
    %666 = vector.load %arg5[%c0_312, %c0_313, %c0_314, %c0_315] : memref<1x1x16x16xf32, #tpu.memory_space<vmem>>, vector<1x1x16x16xf32>
    %667 = vector.shape_cast %666 : vector<1x1x16x16xf32> to vector<16x16xf32>
    %668 = vector.shape_cast %665 : vector<16x16xf32> to vector<1x1x16x16xf32>
    tpu.vector_store %arg5[%c0_312, %c0_313, %c0_314, %c0_315], %668 {strides = array<i32>} : memref<1x1x16x16xf32, #tpu.memory_space<vmem>>, vector<1x1x16x16xf32>,
    return
  }
  func.func @transform_0(%arg0: i32, %arg1: i32) -> (i32, i32, i32, i32) {
    %c0_i32 = arith.constant 0 : i32
    %c0_i32_0 = arith.constant 0 : i32
    %c0_i32_1 = arith.constant 0 : i32
    return %arg0, %arg1, %c0_i32, %c0_i32_0 : i32, i32, i32, i32
  }
  func.func @transform_1(%arg0: i32, %arg1: i32) -> i32 {
    %c0_i32 = arith.constant 0 : i32
    %c0_i32_0 = arith.constant 0 : i32
    return %c0_i32 : i32
  }
  func.func @transform_2(%arg0: i32, %arg1: i32) -> i32 {
    %c0_i32 = arith.constant 0 : i32
    %c0_i32_0 = arith.constant 0 : i32
    return %c0_i32 : i32
  }
  func.func @transform_3(%arg0: i32, %arg1: i32) -> (i32, i32, i32, i32) {
    %c0_i32 = arith.constant 0 : i32
    %c0_i32_0 = arith.constant 0 : i32
    %c0_i32_1 = arith.constant 0 : i32
    return %arg0, %arg1, %c0_i32, %c0_i32_0 : i32, i32, i32, i32
  }
}

</mosaic_0001>

<bundles_post_ra>
// kernel: tpu_custom_call.1
= control target key start
LH: loop header
LB: loop body
LE: loop exit
PB: predicated region body
PF: predicated region fallthrough
CT: control target
= control target key end

     0   :  { %s2668_s0 = inlined_call_operand.hbm [shape: f32[2,4,16,16], index: 0, kind: input, shape index: {}]   ;;  %s2669_s1 = inlined_call_operand.hbm [shape: f32[324], index: 1, kind: input, shape index: {}]   ;;  %s2670_s2 = inlined_call_operand.vmem [shape: f32[4], index: 2, kind: input, shape index: {}]   ;;  %s2671_s3 = inlined_call_operand.hbm [shape: f32[2,4,16,16], index: 3, kind: output, shape index: {}]  }
   0x1   :  { %2678 = sst [smem:[#allocation20_spill]] %s2669_s1 }
   0x2   :  { %2679 = sst [smem:[#allocation21_spill]] %s2670_s2 }
   0x3   :  { %8 = vsyncpa [#allocation4], 0 }
   0x4   :  { %10 = vsyncpa [#allocation4 + $0x1], 0 }
   0x5   :  { %11 = vsyncpa [#allocation6], 0 }
   0x6   :  { %12 = vsyncpa [#allocation7], 0 }
   0x7   :  { %13 = vsyncpa [#allocation5], 0 }
   0x8   :  { %15 = vsyncpa [#allocation5 + $0x1], 0  ;;  %s1907_s12 = smov 0   ;;  %s1909_s13 = smov 0  }
   0x9   :  { %s1911_s14 = smov 0   ;;  %s1913_s15 = smov 0  }
   0xa   :  { %s1915_s16 = smov 0   ;;  %s1917_s17 = smov 0  }
   0xb   :  { %s1919_s18 = smov 0   ;;  %s1921_s19 = smov 0  }
   0xc LB: > { %2680 = sst [smem:[#allocation15_spill]] %s1841_s12  ;;  %s1565_s20 = sadd.s32 4294967295, %s1869_s19   ;;  %s1869_s19 = sphi %s1921_s19, %s21_s19   ;;  %s1865_s18 = sphi %s1919_s18, %s2705_s18   ;;  %s1861_s17 = sphi %s1917_s17, %s2700_s17   ;;  %s1857_s16 = sphi %s1915_s16, %s2704_s16   ;;  %s1853_s15 = sphi %s1913_s15, %s2699_s15   ;;  %s1849_s14 = sphi %s1911_s14, %s2703_s14   ;;  %s1845_s13 = sphi %s1909_s13, %s2702_s13   ;;  %s1841_s12 = sphi %s1907_s12, %s2701_s12  }
   0xd   : > { %2681 = sst [smem:[#allocation16_spill]] %s1861_s17  ;;  %s1566_s21 = sadd.s32 4294967294, %s1869_s19  }
   0xe   : > { %2682 = sst [smem:[#allocation17_spill]] %s1869_s19  ;;  %p49_p0 = scmp.ne.s32.totalorder %s1849_s14, %s1845_s13 }
   0xf   : > { %p50_p1 = scmp.eq.s32.totalorder %s1869_s19, 0  ;;  %p55_p2 = scmp.ne.s32.totalorder %s1845_s13, %s1841_s12 }
  0x10   : > { %p1955_p3 = scmp.eq.s32.totalorder %s1565_s20, 0  ;;  %p123_p4 = scmp.eq.s32.totalorder %s1565_s20, 7 }
  0x11   : > { %p1959_p5 = por %p50_p1, %p49_p0  ;;  %p129_p6 = scmp.eq.s32.totalorder %s1566_s21, 7 }
  0x12   : > { %p1965_p7 = por %p1955_p3, %p55_p2  ;;  %p1969_p8 = por %p123_p4, %p49_p0 }
  0x13   : > { %p1973_p9 = por %p129_p6, %p55_p2  ;;  %p1567_p10 = scmp.ge.s32.totalorder %s1869_s19, 1 }
  0x14   : > { %p136_p11 = scmp.lt.s32.totalorder %s1869_s19, 9  ;;  %s2689_s1 = sld [smem:[#allocation20_spill]] }
  0x15   : > { %s2687_s27 = scalar_select %p1973_p9, 1, 0 }
  0x16   : > { %p1982_p12 = pnand %p1567_p10, %p136_p11  ;;  %p1615_p13 = scmp.lt.s32.totalorder %s1869_s19, 8 }
  0x17   : > { %2688 = sst [smem:[#allocation18_spill]] %s2687_s27  ;;  %s1871_s9 = smov [#allocation8]  }
  0x18   : > { %p1598_p0 = pneg %p1982_p12  ;;  %s2691_s2 = sld [smem:[#allocation21_spill]] }
  0x19   : > { %p1994_p1 = pnand %p1615_p13, %p1959_p5  ;;  %s1872_s10 = smov [#allocation9]  }
  0x1a   : > { %s148_s30 = sshll.u32 %s2689_s1, 4  ;;  %p1599_p2 = pnand %p1598_p0, %p1955_p3  ;;  %s149_s30 = int_to_ptr.hbm [resolvable:$true] %s148_s30 }
  0x1b   : > { %s30_s11 = sadd.s32 1, %s1861_s17  ;;  %s33_s20 = sadd.s32 1, %s1865_s18 }
  0x1c   : > { %1601 = dma.hbm_to_smem (!%p1599_p2), %s149_s30, 48, %s1871_s9, [#allocation6]  }
  0x1d   : > { %p31_p4 = scmp.ge.s32.totalorder %s30_s11, 4  ;;  %s169_s21 = sand.u32 1, %s1849_s14  }
  0x1e   : > { %s158_s7 = sshll.u32 %s2691_s2, 4  ;;  %s1571_s28 = sshll.u32 %s169_s21, 4  ;;  %s159_s7 = int_to_ptr.vmem [resolvable:$true] %s158_s7 }
  0x1f   : > { %1604 = dma.vmem_to_smem (!%p1599_p2), %s159_s7, 16, %s1872_s10, [#allocation7]  }
  0x20   : > { %s2707_s11 = smov (%p31_p4, %s30_s11), 0  ;;  %s2709_s20 = smov (!%p31_p4, %s33_s20), %s1865_s18 }
  0x21   : > { %2693 = sst [smem:[#allocation19_spill]] %s2707_s11  ;;  %s38_s24 = ssub.s32 %s1861_s17, %s2707_s11 }
  0x22   : > { %p35_p5 = scmp.ge.s32.totalorder %s2709_s20, 2  ;;  %s1572_s29 = sshll.u32 %s1861_s17, 1 }
  0x23   : > { %s1573_s5 = sshll.u32 %s1865_s18, 3  ;;  %s173_s6 = scalar_lea.vmem [#allocation3], %s1571_s28 }
  0x24   : > { %s183_s30 = sshll.u32 %s173_s6, 4  ;;  %s2711_s20 = smov (%p35_p5, %s2709_s20), 0  ;;  %s184_s30 = int_to_ptr.vmem [resolvable:$true] %s183_s30 }
  0x25   : > { %s178_s7 = sadd.s32 %s1573_s5, %s1572_s29  ;;  %s37_s9 = ssub.s32 %s1865_s18, %s2711_s20 }
  0x26   : > { %s1574_s10 = sshll.u32 %s178_s7, 3  ;;  %s39_s22 = sor.u32 %s38_s24, %s37_s9 }
  0x27   : > { %s180_s11 = scalar_lea.hbm %s2668_s0, %s1574_s10  ;;  %p40_p6 = scmp.eq.s32.totalorder %s39_s22, 0 }
  0x28   : > { %s181_s27 = sshll.u32 %s180_s11, 4  ;;  %s2694_s17 = sadd.s32 1, %s1849_s14  ;;  %s182_s27 = int_to_ptr.hbm [resolvable:$true] %s181_s27 }
  0x29   : > { %s2020_s12 = scalar_select %p40_p6, %s1849_s14, %s2694_s17  }
  0x2a   : > { %s170_s28 = scalar_lea.sflag [#allocation4], %s169_s21  ;;  %s1873_s6 = smov 128  }
  0x2b   : > { %s1874_s19 = smov 8   ;;  %195 = sbr.rel (%p1982_p12) target bundleno = 704 (0x2c0), region = 32 }
  0x2c   : > { %1608 = dma.hbm_to_vmem [thread:$0]  (!%p1994_p1), %s182_s27, 256, %s184_s30, %s170_s28, %s1873_s6, %s1873_s6, %s1874_s19  }
  0x2d   : > { %s2027_s24 = sand.u32 (!%p1982_p12), 1, %s1845_s13  }
  0x2e   : > { %s1576_s1 = sshll.u32 (!%p1982_p12), %s2027_s24, 4  ;;  %s198_s2 = scalar_lea.sflag (!%p1982_p12), [#allocation4], %s2027_s24 }
  0x2f   : > { %s2033_s17 = scalar_lea.vmem (!%p1982_p12), [#allocation3], %s1576_s1 }
  0x30   : > { %1824 = dma.done.wait (%p1965_p7), %s198_s2, 256  }
  0x31   : > { %1826 = vsyncadd (%p1965_p7), %s198_s2, 4294967040 }
  0x32   : > { %1828 = dma.done.wait (%p1955_p3), [#allocation6], 48  }
  0x33   : > { %1830 = vsyncadd (%p1955_p3), [#allocation6], 4294967248 }
  0x34   : > { %1832 = dma.done.wait (%p1955_p3), [#allocation7], 16  }
  0x35   : > { %1834 = vsyncadd (%p1955_p3), [#allocation7], 4294967280 }
  0x36   : > { %217 = sfence }
  0x37   : > { %v240_v0 = vld [vmem:[%s2033_s17] sm:$0xff]  ;;  %s1875_s19 = smov 4   ;;  %v241_v2 = vld [vmem:[%s2033_s17 + $0x8] sm:$0xff]  ;;  %vm236_vm0 = vcmask 195584   ;;  %v1876_v4 = vmov 0.0   ;;  %s2050_s22 = smul.u32 81, %s1853_s15 }
  0x38   : > { %v242_v1 = vmax.f32 %v240_v0, 0.0  ;;  %v243_v3 = vmax.f32 %v241_v2, 0.0  ;;  %237 = vst.msk [vmem:[#allocation2] sm:$0xff] %vm236_vm0, %v1876_v4  ;;  %vm252_vm1 = vcmask 162848   ;;  %s1877_s5 = smov 125   ;;  %s1878_s30 = smov 126  }
  0x39   : > { %238 = vst.msk [vmem:[#allocation2 + $0x8] sm:$0xff] %vm236_vm0, %v1876_v4  ;;  %s296_s23 = sadd.s32 3, %s2050_s22  ;;  %s281_s25 = sadd.s32 2, %s2050_s22  ;;  %vm1430_vm2 = vcmask 130048  }
  0x3a   : > { %246 = vrot.lane.b32.xlu0 %v242_v1, %s1875_s19  ;;  %239 = vst.msk [vmem:[#allocation2 + $0x10] sm:$0xff] %vm236_vm0, %v1876_v4  ;;  %s266_s27 = sadd.s32 1, %s2050_s22  ;;  %s2055_s4 = sld [smem:[#allocation8 + %s296_s23]] }
  0x3b   : > { %s282_s8 = sld [smem:[#allocation8 + %s281_s25]]  ;;  %s311_s21 = sadd.s32 4, %s2050_s22 }
  0x3c   : > { %s267_s11 = sld [smem:[#allocation8 + %s266_s27]]  ;;  %s341_s7 = sadd.s32 6, %s2050_s22 }
  0x3d   : > { %s312_s29 = sld [smem:[#allocation8 + %s311_s21]]  ;;  %s1879_s9 = smov 127  }
  0x3e   : > { %s2068_s10 = sld [smem:[#allocation8 + %s341_s7]]  ;;  %s1880_s28 = smov 124  }
  0x3f   : > { %s326_s6 = sadd.s32 5, %s2050_s22  ;;  %s356_s2 = sadd.s32 7, %s2050_s22 }
  0x40   : > { %v298_v6 = vstv %s2055_s4  ;;  %s357_s23 = sld [smem:[#allocation8 + %s356_s2]]  ;;  %s1881_s25 = smov 122  }
  0x41   : > { %v283_v7 = vstv %s282_s8  ;;  %s395_s27 = sadd.s32 10, %s2050_s22  ;;  %s1882_s8 = smov 121  }
  0x42   : > { %248 = vrot.lane.b32.xlu0 %v243_v3, %s1875_s19  ;;  %v268_v8 = vstv %s267_s11  ;;  %s327_s19 = sld [smem:[#allocation8 + %s326_s6]]  ;;  %s1883_s11 = smov 123  }
  0x43   : > { %v313_v15 = vstv %s312_s29  ;;  %s2088_s4 = sld [smem:[#allocation8 + %s395_s27]]  ;;  %s371_s21 = sadd.s32 8, %s2050_s22 }
  0x44   : > { %v343_v19 = vstv %s2068_s10  ;;  %s410_s29 = sadd.s32 11, %s2050_s22  ;;  %s372_s7 = sld [smem:[#allocation8 + %s371_s21]] }
  0x45   : > { %s411_s10 = sld [smem:[#allocation8 + %s410_s29]]  ;;  %s440_s6 = sadd.s32 13, %s2050_s22 }
  0x46   : > { %v358_v24 = vstv %s357_s23  ;;  %s2110_s2 = sld [smem:[#allocation8 + %s440_s6]]  ;;  %s425_s23 = sadd.s32 12, %s2050_s22 }
  0x47   : > { %s455_s27 = sadd.s32 14, %s2050_s22  ;;  %s485_s29 = sadd.s32 16, %s2050_s22 }
  0x48   : > { %v328_v23 = vstv %s327_s19  ;;  %s1884_s19 = smov 120   ;;  %s456_s21 = sld [smem:[#allocation8 + %s455_s27]] }
  0x49   : > { %v397_v29 = vstv %s2088_s4  ;;  %s426_s4 = sld [smem:[#allocation8 + %s425_s23]]  ;;  %s500_s6 = sadd.s32 17, %s2050_s22 }
  0x4a   : > { %v373_v34 = vstv %s372_s7  ;;  %s2128_s7 = sld [smem:[#allocation8 + %s485_s29]]  ;;  %s539_s27 = sadd.s32 20, %s2050_s22 }
  0x4b   : > { %v412_v35 = vstv %s411_s10  ;;  %s470_s10 = sadd.s32 15, %s2050_s22  ;;  %s501_s23 = sld [smem:[#allocation8 + %s500_s6]] }
  0x4c   : > { %v442_v39 = vstv %s2110_s2  ;;  %s471_s2 = sld [smem:[#allocation8 + %s470_s10]]  ;;  %s554_s29 = sadd.s32 21, %s2050_s22 }
  0x4d   : > { %s555_s10 = sld [smem:[#allocation8 + %s554_s29]]  ;;  %s584_s6 = sadd.s32 23, %s2050_s22 }
  0x4e   : > { %v457_v44 = vstv %s456_s21  ;;  %s524_s21 = sadd.s32 19, %s2050_s22  ;;  %s629_s29 = sadd.s32 26, %s2050_s22 }
  0x4f   : > { %v427_v43 = vstv %s426_s4  ;;  %s2146_s4 = sld [smem:[#allocation8 + %s539_s27]]  ;;  %s599_s27 = sadd.s32 24, %s2050_s22 }
  0x50   : > { %v487_v48 = vstv %s2128_s7  ;;  %s525_s7 = sld [smem:[#allocation8 + %s524_s21]] }
  0x51   : > { %v502_v53 = vstv %s501_s23  ;;  %s569_s23 = sadd.s32 22, %s2050_s22  ;;  %s600_s21 = sld [smem:[#allocation8 + %s599_s27]] }
  0x52   : > { %v472_v52 = vstv %s471_s2  ;;  %s2168_s2 = sld [smem:[#allocation8 + %s584_s6]] }
  0x53   : > { %v556_v0 = vstv %s555_s10  ;;  %s2189_s10 = sld [smem:[#allocation8 + %s2050_s22]] }
  0x54   : > { %s2195_s6 = sld [smem:[#allocation9 + %s1853_s15]] }
  0x55   : > { %v541_v58 = vstv %s2146_s4  ;;  %s570_s4 = sld [smem:[#allocation8 + %s569_s23]]  ;;  %s653_s23 = sadd.s32 28, %s2050_s22 }
  0x56   : > { %v526_v63 = vstv %s525_s7  ;;  %s2186_s7 = sld [smem:[#allocation8 + %s629_s29]] }
  0xac   : > { %v247_v5 = vpop.permute.xlu0 %246 }
  0xad   : > { %253 = vst.msk [vmem:[#allocation2 + $0x4] sm:$0xff] %vm252_vm1, %v247_v5  ;;  %v586_v5 = vstv %s2168_s2  ;;  %s614_s2 = sadd.s32 25, %s2050_s22 }
  0xae   : > { %s615_s27 = sld [smem:[#allocation8 + %s614_s2]] }
  0xb4   : > { %v249_v9 = vpop.permute.xlu0 %248  ;;  %v2059_v10 = vld [vmem:[#allocation2] sm:$0xff] }
  0xb5   : > { %254 = vst.msk [vmem:[#allocation2 + $0xc] sm:$0xff] %vm252_vm1, %v249_v9  ;;  %v299_v11 = vmul.f32 %v298_v6, %v2059_v10  ;;  %v284_v12 = vmul.f32 %v283_v7, %v2059_v10  ;;  %v269_v13 = vmul.f32 %v268_v8, %v2059_v10  ;;  %v344_v20 = vmul.f32 %v343_v19, %v2059_v10  ;;  %v2098_v28 = vld [vmem:[#allocation2 + $0x1] sm:$0xff] }
  0xb6   : > { %v314_v21 = vmul.f32 %v313_v15, %v2059_v10  ;;  %v329_v27 = vmul.f32 %v328_v23, %v2059_v10  ;;  %v398_v30 = vmul.f32 %v397_v29, %v2098_v28  ;;  %v359_v31 = vmul.f32 %v358_v24, %v2059_v10  ;;  %v2156_v57 = vld [vmem:[#allocation2 + $0x2] sm:$0xff] }
  0xb7   : > { %303 = vrot.lane.b32.xlu0 %v299_v11, %s1877_s5  ;;  %288 = vrot.lane.b32.xlu2 %v284_v12, %s1878_s30  ;;  %v374_v38 = vmul.f32 %v373_v34, %v2059_v10  ;;  %v443_v40 = vmul.f32 %v442_v39, %v2098_v28  ;;  %v413_v41 = vmul.f32 %v412_v35, %v2098_v28  ;;  %v571_v11 = vstv %s570_s4  ;;  %s2204_s4 = sld [smem:[#allocation8 + %s653_s23]]  ;;  %s728_s23 = sadd.s32 33, %s2050_s22 }
  0xb8   : > { %273 = vrot.lane.b32.xlu1 %v269_v13, %s1879_s9  ;;  %v428_v47 = vmul.f32 %v427_v43, %v2098_v28  ;;  %v488_v49 = vmul.f32 %v487_v48, %v2098_v28  ;;  %v458_v50 = vmul.f32 %v457_v44, %v2098_v28  ;;  %v473_v56 = vmul.f32 %v472_v52, %v2098_v28 }
  0xb9   : > { %v542_v59 = vmul.f32 %v541_v58, %v2156_v57  ;;  %v503_v60 = vmul.f32 %v502_v53, %v2098_v28  ;;  %v527_v3 = vmul.f32 %v526_v63, %v2156_v57  ;;  %v601_v12 = vstv %s600_s21  ;;  %s683_s21 = sadd.s32 30, %s2050_s22 }
  0xba   : > { %s2217_s29 = sld [smem:[#allocation8 + %s683_s21]]  ;;  %s743_s21 = sadd.s32 34, %s2050_s22 }
  0xbc   : > { %v2070_v14 = vld [vmem:[#allocation2 + $0x8] sm:$0xff] }
  0xbd   : > { %v285_v16 = vmul.f32 %v283_v7, %v2070_v14  ;;  %v270_v17 = vmul.f32 %v268_v8, %v2070_v14  ;;  %v315_v18 = vmul.f32 %v313_v15, %v2070_v14  ;;  %v300_v22 = vmul.f32 %v298_v6, %v2070_v14  ;;  %v2108_v33 = vld [vmem:[#allocation2 + $0x9] sm:$0xff] }
  0xbe   : > { %v360_v25 = vmul.f32 %v358_v24, %v2070_v14  ;;  %v330_v26 = vmul.f32 %v328_v23, %v2070_v14  ;;  %v345_v32 = vmul.f32 %v343_v19, %v2070_v14  ;;  %v414_v36 = vmul.f32 %v412_v35, %v2108_v33  ;;  %v2166_v62 = vld [vmem:[#allocation2 + $0xa] sm:$0xff] }
  0xbf   : > { %320 = vrot.lane.b32.xlu0 %v315_v18, %s1880_s28  ;;  %290 = vrot.lane.b32.xlu2 %v285_v16, %s1878_s30  ;;  %v375_v37 = vmul.f32 %v373_v34, %v2070_v14  ;;  %v399_v42 = vmul.f32 %v397_v29, %v2108_v33  ;;  %v459_v45 = vmul.f32 %v457_v44, %v2108_v33  ;;  %v631_v18 = vstv %s2186_s7  ;;  %s668_s7 = sadd.s32 29, %s2050_s22 }
  0xc0   : > { %275 = vrot.lane.b32.xlu1 %v270_v17, %s1879_s9  ;;  %v429_v46 = vmul.f32 %v427_v43, %v2108_v33  ;;  %v444_v51 = vmul.f32 %v442_v39, %v2108_v33  ;;  %v504_v54 = vmul.f32 %v502_v53, %v2108_v33  ;;  %v474_v55 = vmul.f32 %v472_v52, %v2108_v33 }
  0xc1   : > { %v489_v61 = vmul.f32 %v487_v48, %v2108_v33  ;;  %v558_v1 = vmul.f32 %v556_v0, %v2166_v62  ;;  %v528_v2 = vmul.f32 %v526_v63, %v2166_v62  ;;  %v587_v6 = vmul.f32 %v586_v5, %v2156_v57 }
  0xc2   : > { %v557_v7 = vmul.f32 %v556_v0, %v2156_v57  ;;  %v543_v8 = vmul.f32 %v541_v58, %v2166_v62  ;;  %v603_v13 = vmul.f32 %v601_v12, %v2166_v62  ;;  %v573_v15 = vmul.f32 %v571_v11, %v2166_v62 }
  0xc3   : > { %v572_v16 = vmul.f32 %v571_v11, %v2156_v57  ;;  %v261_v19 = vstv %s2189_s10  ;;  %v588_v23 = vmul.f32 %v586_v5, %v2166_v62  ;;  %v257_v24 = vstv %s2195_s6  ;;  %s698_s10 = sadd.s32 31, %s2050_s22  ;;  %s669_s6 = sld [smem:[#allocation8 + %s668_s7]] }
  0xc4   : > { %s2232_s2 = sld [smem:[#allocation8 + %s698_s10]]  ;;  %s388_s7 = sadd.s32 9, %s2050_s22 }
  0xc5   : > { %s2254_s10 = sld [smem:[#allocation8 + %s743_s21]] }
  0xc7   : > { %348 = vrot.lane.b32.xlu0 %v344_v20, %s1881_s25  ;;  %318 = vrot.lane.b32.xlu2 %v314_v21, %s1880_s28  ;;  %v632_v20 = vmul.f32 %v631_v18, %v2156_v57  ;;  %v602_v21 = vmul.f32 %v601_v12, %v2156_v57 }
  0xc8   : > { %305 = vrot.lane.b32.xlu1 %v300_v22, %s1877_s5  ;;  %v262_v22 = vmul.f32 %v261_v19, %v2059_v10 }
  0xcf   : > { %365 = vrot.lane.b32.xlu0 %v360_v25, %s1882_s8  ;;  %335 = vrot.lane.b32.xlu2 %v330_v26, %s1883_s11 }
  0xd0   : > { %333 = vrot.lane.b32.xlu1 %v329_v27, %s1883_s11  ;;  %v264_v27 = vadd.f32 %v262_v22, %v257_v24 }
  0xd7   : > { %402 = vrot.lane.b32.xlu0 %v398_v30, %s1879_s9  ;;  %363 = vrot.lane.b32.xlu2 %v359_v31, %s1882_s8  ;;  %v2215_v30 = vld [vmem:[#allocation2 + $0xb] sm:$0xff]  ;;  %v616_v31 = vstv %s615_s27  ;;  %s2241_s27 = sld [smem:[#allocation8 + %s728_s23]] }
  0xd8   : > { %350 = vrot.lane.b32.xlu1 %v345_v32, %s1881_s25  ;;  %v655_v32 = vstv %s2204_s4  ;;  %s713_s4 = sadd.s32 32, %s2050_s22 }
  0xd9   : > { %v657_v35 = vmul.f32 %v655_v32, %v2215_v30 }
  0xdf   : > { %419 = vrot.lane.b32.xlu0 %v414_v36, %s1878_s30  ;;  %380 = vrot.lane.b32.xlu2 %v375_v37, %s1884_s19  ;;  %v618_v36 = vmul.f32 %v616_v31, %v2166_v62  ;;  %v263_v37 = vmul.f32 %v261_v19, %v2070_v14  ;;  %v685_v14 = vstv %s2217_s29  ;;  %s714_s29 = sld [smem:[#allocation8 + %s713_s4]]  ;;  %s797_s4 = sadd.s32 38, %s2050_s22 }
  0xe0   : > { %378 = vrot.lane.b32.xlu1 %v374_v38, %s1884_s19  ;;  %v617_v38 = vmul.f32 %v616_v31, %v2156_v57 }
  0xe7   : > { %447 = vrot.lane.b32.xlu0 %v443_v40, %s1880_s28  ;;  %417 = vrot.lane.b32.xlu2 %v413_v41, %s1878_s30 }
  0xe8   : > { %404 = vrot.lane.b32.xlu1 %v399_v42, %s1879_s9  ;;  %v265_v42 = vadd.f32 %v263_v37, %v257_v24 }
  0xef   : > { %464 = vrot.lane.b32.xlu0 %v459_v45, %s1883_s11  ;;  %434 = vrot.lane.b32.xlu2 %v429_v46, %s1877_s5  ;;  %v2229_v45 = vld [vmem:[#allocation2 + $0x3] sm:$0xff] }
  0xf0   : > { %432 = vrot.lane.b32.xlu1 %v428_v47, %s1877_s5  ;;  %v686_v47 = vmul.f32 %v685_v14, %v2229_v45  ;;  %v656_v48 = vmul.f32 %v655_v32, %v2229_v45 }
  0xf7   : > { %492 = vrot.lane.b32.xlu0 %v488_v49, %s1882_s8  ;;  %462 = vrot.lane.b32.xlu2 %v458_v50, %s1883_s11  ;;  %v633_v50 = vmul.f32 %v631_v18, %v2166_v62 }
  0xf8   : > { %449 = vrot.lane.b32.xlu1 %v444_v51, %s1880_s28 }
  0xff   : > { %509 = vrot.lane.b32.xlu0 %v504_v54, %s1884_s19  ;;  %479 = vrot.lane.b32.xlu2 %v474_v55, %s1881_s25  ;;  %v670_v55 = vstv %s669_s6  ;;  %s2259_s6 = sld [smem:[#allocation8 + %s388_s7]]  ;;  %s827_s7 = sadd.s32 40, %s2050_s22 }
 0x100   : > { %477 = vrot.lane.b32.xlu1 %v473_v56, %s1881_s25  ;;  %v700_v56 = vstv %s2232_s2  ;;  %s782_s2 = sadd.s32 37, %s2050_s22 }
 0x101   : > { %s2265_s23 = sld [smem:[#allocation8 + %s782_s2]]  ;;  %s842_s2 = sadd.s32 41, %s2050_s22 }
 0x105   : > { %v390_v22 = vstv %s2259_s6  ;;  %s812_s6 = sadd.s32 39, %s2050_s22 }
 0x106   : > { %v392_v24 = vmul.f32 %v390_v22, %v2108_v33  ;;  %v391_v32 = vmul.f32 %v390_v22, %v2098_v28 }
 0x107   : > { %546 = vrot.lane.b32.xlu0 %v542_v59, %s1878_s30  ;;  %507 = vrot.lane.b32.xlu2 %v503_v60, %s1884_s19  ;;  %v702_v59 = vmul.f32 %v700_v56, %v2215_v30  ;;  %v672_v60 = vmul.f32 %v670_v55, %v2215_v30  ;;  %v784_v31 = vstv %s2265_s23  ;;  %s813_s23 = sld [smem:[#allocation8 + %s812_s6]]  ;;  %s887_s6 = sadd.s32 44, %s2050_s22 }
 0x108   : > { %494 = vrot.lane.b32.xlu1 %v489_v61, %s1882_s8  ;;  %v671_v61 = vmul.f32 %v670_v55, %v2229_v45 }
 0x10f   : > { %563 = vrot.lane.b32.xlu0 %v558_v1, %s1877_s5  ;;  %533 = vrot.lane.b32.xlu2 %v528_v2, %s1879_s9 }
 0x110   : > { %531 = vrot.lane.b32.xlu1 %v527_v3, %s1879_s9  ;;  %v730_v3 = vstv %s2241_s27  ;;  %s758_s27 = sadd.s32 35, %s2050_s22 }
 0x111   : > { %v289_v4 = vpop.permute.xlu2 %288  ;;  %s759_s21 = sld [smem:[#allocation8 + %s758_s27]]  ;;  %v732_v37 = vmul.f32 %v730_v3, %v2215_v30 }
 0x112   : > { %s2305_s27 = sld [smem:[#allocation8 + %s842_s2]] }
 0x117   : > { %591 = vrot.lane.b32.xlu0 %v587_v6, %s1883_s11  ;;  %561 = vrot.lane.b32.xlu2 %v557_v7, %s1877_s5  ;;  %v731_v6 = vmul.f32 %v730_v3, %v2229_v45  ;;  %v701_v7 = vmul.f32 %v700_v56, %v2229_v45  ;;  %v814_v3 = vstv %s813_s23  ;;  %s2329_s23 = sld [smem:[#allocation8 + %s887_s6]]  ;;  %s971_s6 = sadd.s32 50, %s2050_s22 }
 0x118   : > { %548 = vrot.lane.b32.xlu1 %v543_v8, %s1878_s30  ;;  %v687_v8 = vmul.f32 %v685_v14, %v2215_v30 }
 0x119   : > { %v291_v9 = vpop.permute.xlu2 %290 }
 0x11f   : > { %608 = vrot.lane.b32.xlu0 %v603_v13, %s1881_s25  ;;  %578 = vrot.lane.b32.xlu2 %v573_v15, %s1880_s28 }
 0x120   : > { %576 = vrot.lane.b32.xlu1 %v572_v16, %s1880_s28  ;;  %v715_v16 = vstv %s714_s29  ;;  %s2282_s29 = sld [smem:[#allocation8 + %s797_s4]]  ;;  %s872_s4 = sadd.s32 43, %s2050_s22 }
 0x121   : > { %v319_v17 = vpop.permute.xlu2 %318 }
 0x126   : > { %v799_v14 = vstv %s2282_s29  ;;  %s2315_s29 = sld [smem:[#allocation8 + %s872_s4]] }
 0x127   : > { %636 = vrot.lane.b32.xlu0 %v632_v20, %s1884_s19  ;;  %606 = vrot.lane.b32.xlu2 %v602_v21, %s1881_s25  ;;  %v717_v20 = vmul.f32 %v715_v16, %v2215_v30  ;;  %v716_v21 = vmul.f32 %v715_v16, %v2229_v45 }
 0x128   : > { %593 = vrot.lane.b32.xlu1 %v588_v23, %s1883_s11 }
 0x129   : > { %v304_v25 = vpop.permute.xlu0 %303  ;;  %v336_v26 = vpop.permute.xlu2 %335 }
 0x12a   : > { %v274_v29 = vpop.permute.xlu1 %273 }
 0x12b   : > { %v279_v10 = vadd.f32 %v274_v29, %v264_v27 }
 0x12d   : > { %v294_v34 = vadd.f32 %v289_v4, %v279_v10  ;;  %v2278_v10 = vld [vmem:[#allocation2 + $0x4] sm:$0xff] }
 0x12e   : > { %v785_v33 = vmul.f32 %v784_v31, %v2278_v10 }
 0x12f   : > { %662 = vrot.lane.b32.xlu0 %v657_v35, %s1879_s9  ;;  %623 = vrot.lane.b32.xlu2 %v618_v36, %s1882_s8  ;;  %v309_v39 = vadd.f32 %v304_v25, %v294_v34 }
 0x130   : > { %621 = vrot.lane.b32.xlu1 %v617_v38, %s1882_s8 }
 0x131   : > { %v321_v40 = vpop.permute.xlu0 %320  ;;  %v364_v41 = vpop.permute.xlu2 %363  ;;  %v324_v43 = vadd.f32 %v319_v17, %v309_v39  ;;  %v745_v17 = vstv %s2254_s10  ;;  %s2293_s10 = sld [smem:[#allocation8 + %s827_s7]] }
 0x132   : > { %v276_v44 = vpop.permute.xlu1 %275  ;;  %v747_v19 = vmul.f32 %v745_v17, %v2215_v30  ;;  %v746_v36 = vmul.f32 %v745_v17, %v2229_v45 }
 0x133   : > { %v280_v46 = vadd.f32 %v276_v44, %v265_v42  ;;  %v2291_v42 = vld [vmem:[#allocation2 + $0xc] sm:$0xff]  ;;  %v760_v44 = vstv %s759_s21  ;;  %s517_s21 = sadd.s32 18, %s2050_s22 }
 0x134   : > { %s2318_s7 = sld [smem:[#allocation8 + %s517_s21]]  ;;  %s941_s21 = sadd.s32 48, %s2050_s22 }
 0x135   : > { %v295_v49 = vadd.f32 %v291_v9, %v280_v46 }
 0x137   : > { %690 = vrot.lane.b32.xlu0 %v686_v47, %s1877_s5  ;;  %660 = vrot.lane.b32.xlu2 %v656_v48, %s1879_s9  ;;  %v801_v47 = vmul.f32 %v799_v14, %v2291_v42  ;;  %v762_v48 = vmul.f32 %v760_v44, %v2215_v30 }
 0x138   : > { %638 = vrot.lane.b32.xlu1 %v633_v50, %s1884_s19 }
 0x139   : > { %v349_v51 = vpop.permute.xlu0 %348  ;;  %v381_v52 = vpop.permute.xlu2 %380 }
 0x13a   : > { %v306_v53 = vpop.permute.xlu1 %305  ;;  %v519_v17 = vstv %s2318_s7  ;;  %s2352_s7 = sld [smem:[#allocation8 + %s941_s21]] }
 0x13b   : > { %v310_v54 = vadd.f32 %v306_v53, %v295_v49  ;;  %v761_v49 = vmul.f32 %v760_v44, %v2229_v45  ;;  %v520_v22 = vmul.f32 %v519_v17, %v2156_v57 }
 0x13d   : > { %v325_v58 = vadd.f32 %v321_v40, %v310_v54  ;;  %v829_v54 = vstv %s2293_s10  ;;  %s857_s10 = sadd.s32 42, %s2050_s22 }
 0x13e   : > { %s858_s2 = sld [smem:[#allocation8 + %s857_s10]] }
 0x13f   : > { %707 = vrot.lane.b32.xlu0 %v702_v59, %s1880_s28  ;;  %677 = vrot.lane.b32.xlu2 %v672_v60, %s1878_s30  ;;  %v340_v63 = vadd.f32 %v336_v26, %v325_v58  ;;  %v830_v58 = vmul.f32 %v829_v54, %v2278_v10  ;;  %v800_v59 = vmul.f32 %v799_v14, %v2278_v10 }
 0x140   : > { %675 = vrot.lane.b32.xlu1 %v671_v61, %s1878_s30  ;;  %v786_v60 = vmul.f32 %v784_v31, %v2291_v42 }
 0x141   : > { %v366_v0 = vpop.permute.xlu0 %365  ;;  %v418_v1 = vpop.permute.xlu2 %417 }
 0x142   : > { %v334_v2 = vpop.permute.xlu1 %333 }
 0x143   : > { %v339_v4 = vadd.f32 %v334_v2, %v324_v43 }
 0x144   : > { %v859_v31 = vstv %s858_s2  ;;  %s2367_s2 = sld [smem:[#allocation8 + %s971_s6]] }
 0x145   : > { %v354_v5 = vadd.f32 %v349_v51, %v339_v4  ;;  %v844_v4 = vstv %s2305_s27  ;;  %s926_s27 = sadd.s32 47, %s2050_s22  ;;  %v861_v57 = vmul.f32 %v859_v31, %v2291_v42 }
 0x146   : > { %s2340_s4 = sld [smem:[#allocation8 + %s926_s27]]  ;;  %s956_s27 = sadd.s32 49, %s2050_s22 }
 0x147   : > { %735 = vrot.lane.b32.xlu0 %v731_v6, %s1881_s25  ;;  %705 = vrot.lane.b32.xlu2 %v701_v7, %s1880_s28  ;;  %v369_v9 = vadd.f32 %v364_v41, %v354_v5  ;;  %v846_v6 = vmul.f32 %v844_v4, %v2291_v42  ;;  %v816_v7 = vmul.f32 %v814_v3, %v2291_v42  ;;  %s957_s21 = sld [smem:[#allocation8 + %s956_s27]] }
 0x148   : > { %692 = vrot.lane.b32.xlu1 %v687_v8, %s1877_s5  ;;  %v815_v8 = vmul.f32 %v814_v3, %v2278_v10 }
 0x149   : > { %v403_v11 = vpop.permute.xlu0 %402  ;;  %v435_v12 = vpop.permute.xlu2 %434 }
 0x14a   : > { %v351_v13 = vpop.permute.xlu1 %350 }
 0x14b   : > { %v355_v15 = vadd.f32 %v351_v13, %v340_v63 }
 0x14d   : > { %v370_v18 = vadd.f32 %v366_v0, %v355_v15  ;;  %v874_v15 = vstv %s2315_s29  ;;  %s911_s29 = sadd.s32 46, %s2050_s22 }
 0x14e   : > { %s912_s10 = sld [smem:[#allocation8 + %s911_s29]]  ;;  %s1016_s29 = sadd.s32 53, %s2050_s22 }
 0x14f   : > { %752 = vrot.lane.b32.xlu0 %v747_v19, %s1882_s8  ;;  %722 = vrot.lane.b32.xlu2 %v717_v20, %s1883_s11  ;;  %v385_v23 = vadd.f32 %v381_v52, %v370_v18  ;;  %v875_v19 = vmul.f32 %v874_v15, %v2278_v10  ;;  %v845_v20 = vmul.f32 %v844_v4, %v2278_v10 }
 0x150   : > { %720 = vrot.lane.b32.xlu1 %v716_v21, %s1883_s11  ;;  %v831_v21 = vmul.f32 %v829_v54, %v2291_v42 }
 0x151   : > { %v420_v25 = vpop.permute.xlu0 %419  ;;  %v463_v26 = vpop.permute.xlu2 %462  ;;  %v394_v27 = vadd.f32 %v392_v24, %v385_v23 }
 0x152   : > { %v379_v29 = vpop.permute.xlu1 %378 }
 0x153   : > { %v384_v34 = vadd.f32 %v379_v29, %v369_v9 }
 0x154   : > { %v913_v54 = vstv %s912_s10  ;;  %s2388_s10 = sld [smem:[#allocation8 + %s1016_s29]] }
 0x155   : > { %v393_v35 = vadd.f32 %v391_v32, %v384_v34  ;;  %v889_v32 = vstv %s2329_s23  ;;  %s986_s23 = sadd.s32 51, %s2050_s22 }
 0x157   : > { %789 = vrot.lane.b32.xlu0 %v785_v33, %s1879_s9  ;;  %750 = vrot.lane.b32.xlu2 %v746_v36, %s1882_s8  ;;  %v408_v38 = vadd.f32 %v403_v11, %v393_v35  ;;  %v891_v35 = vmul.f32 %v889_v32, %v2291_v42  ;;  %v521_v33 = vmul.f32 %v519_v17, %v2166_v62  ;;  %v928_v62 = vstv %s2340_s4  ;;  %s2377_s4 = sld [smem:[#allocation8 + %s986_s23]]  ;;  %s1001_s23 = sadd.s32 52, %s2050_s22 }
 0x158   : > { %737 = vrot.lane.b32.xlu1 %v732_v37, %s1881_s25  ;;  %v860_v36 = vmul.f32 %v859_v31, %v2278_v10 }
 0x159   : > { %v448_v28 = vpop.permute.xlu0 %447  ;;  %v480_v39 = vpop.permute.xlu2 %479  ;;  %v423_v40 = vadd.f32 %v418_v1, %v408_v38 }
 0x15a   : > { %v405_v41 = vpop.permute.xlu1 %404 }
 0x15b   : > { %v409_v43 = vadd.f32 %v405_v41, %v394_v27  ;;  %v2354_v41 = vld [vmem:[#allocation2 + $0x5] sm:$0xff] }
 0x15c   : > { %v929_v14 = vmul.f32 %v928_v62, %v2354_v41 }
 0x15d   : > { %v424_v46 = vadd.f32 %v420_v25, %v409_v43 }
 0x15f   : > { %806 = vrot.lane.b32.xlu0 %v801_v47, %s1878_s30  ;;  %767 = vrot.lane.b32.xlu2 %v762_v48, %s1884_s19  ;;  %v439_v50 = vadd.f32 %v435_v12, %v424_v46  ;;  %v890_v46 = vmul.f32 %v889_v32, %v2278_v10  ;;  %v876_v47 = vmul.f32 %v874_v15, %v2291_v42  ;;  %v958_v15 = vstv %s957_s21  ;;  %s1070_s21 = sadd.s32 57, %s2050_s22 }
 0x160   : > { %765 = vrot.lane.b32.xlu1 %v761_v49, %s1884_s19  ;;  %s2416_s29 = sld [smem:[#allocation8 + %s1070_s21]]  ;;  %s1100_s21 = sadd.s32 59, %s2050_s22 }
 0x161   : > { %v465_v51 = vpop.permute.xlu0 %464  ;;  %v508_v52 = vpop.permute.xlu2 %507 }
 0x162   : > { %v433_v53 = vpop.permute.xlu1 %432 }
 0x163   : > { %v438_v55 = vadd.f32 %v433_v53, %v423_v40  ;;  %v943_v53 = vstv %s2352_s7  ;;  %s646_s7 = sadd.s32 27, %s2050_s22 }
 0x164   : > { %s2391_s6 = sld [smem:[#allocation8 + %s646_s7]]  ;;  %s1085_s7 = sadd.s32 58, %s2050_s22 }
 0x165   : > { %v453_v56 = vadd.f32 %v448_v28, %v438_v55 }
 0x167   : > { %834 = vrot.lane.b32.xlu0 %v830_v58, %s1880_s28  ;;  %804 = vrot.lane.b32.xlu2 %v800_v59, %s1878_s30  ;;  %v468_v61 = vadd.f32 %v463_v26, %v453_v56 }
 0x168   : > { %791 = vrot.lane.b32.xlu1 %v786_v60, %s1879_s9  ;;  %v914_v60 = vmul.f32 %v913_v54, %v2354_v41 }
 0x169   : > { %v493_v63 = vpop.permute.xlu0 %492  ;;  %v534_v0 = vpop.permute.xlu2 %533 }
 0x16a   : > { %v450_v1 = vpop.permute.xlu1 %449 }
 0x16b   : > { %v454_v2 = vadd.f32 %v450_v1, %v439_v50 }
 0x16d   : > { %v469_v5 = vadd.f32 %v465_v51, %v454_v2  ;;  %v973_v2 = vstv %s2367_s2  ;;  %s1040_s2 = sadd.s32 55, %s2050_s22 }
 0x16e   : > { %s2401_s27 = sld [smem:[#allocation8 + %s1040_s2]] }
 0x16f   : > { %851 = vrot.lane.b32.xlu0 %v846_v6, %s1883_s11  ;;  %821 = vrot.lane.b32.xlu2 %v816_v7, %s1877_s5  ;;  %v484_v9 = vadd.f32 %v480_v39, %v469_v5  ;;  %v974_v5 = vmul.f32 %v973_v2, %v2354_v41  ;;  %v944_v6 = vmul.f32 %v943_v53, %v2354_v41 }
 0x170   : > { %819 = vrot.lane.b32.xlu1 %v815_v8, %s1877_s5 }
 0x171   : > { %v510_v11 = vpop.permute.xlu0 %509  ;;  %v562_v12 = vpop.permute.xlu2 %561 }
 0x172   : > { %v478_v13 = vpop.permute.xlu1 %477 }
 0x173   : > { %v483_v16 = vadd.f32 %v478_v13, %v468_v61  ;;  %v988_v13 = vstv %s2377_s4  ;;  %s1002_s4 = sld [smem:[#allocation8 + %s1001_s23]]  ;;  %s1115_s23 = sadd.s32 60, %s2050_s22 }
 0x174   : > { %v989_v32 = vmul.f32 %v988_v13, %v2354_v41 }
 0x175   : > { %v498_v18 = vadd.f32 %v493_v63, %v483_v16 }
 0x177   : > { %879 = vrot.lane.b32.xlu0 %v875_v19, %s1882_s8  ;;  %849 = vrot.lane.b32.xlu2 %v845_v20, %s1883_s11  ;;  %v513_v23 = vadd.f32 %v508_v52, %v498_v18  ;;  %v2364_v52 = vld [vmem:[#allocation2 + $0xd] sm:$0xff]  ;;  %v959_v20 = vmul.f32 %v958_v15, %v2354_v41 }
 0x178   : > { %836 = vrot.lane.b32.xlu1 %v831_v21, %s1880_s28  ;;  %v945_v58 = vmul.f32 %v943_v53, %v2364_v52  ;;  %v915_v59 = vmul.f32 %v913_v54, %v2364_v52  ;;  %v930_v7 = vmul.f32 %v928_v62, %v2364_v52  ;;  %v990_v18 = vmul.f32 %v988_v13, %v2364_v52 }
 0x179   : > { %v547_v24 = vpop.permute.xlu0 %546  ;;  %v579_v25 = vpop.permute.xlu2 %578  ;;  %v522_v26 = vadd.f32 %v520_v22, %v513_v23  ;;  %v960_v19 = vmul.f32 %v958_v15, %v2364_v52  ;;  %v1072_v53 = vstv %s2416_s29 }
 0x17a   : > { %v495_v27 = vpop.permute.xlu1 %494 }
 0x17b   : > { %v499_v29 = vadd.f32 %v495_v27, %v484_v9 }
 0x17d   : > { %v514_v34 = vadd.f32 %v510_v11, %v499_v29 }
 0x17f   : > { %896 = vrot.lane.b32.xlu0 %v891_v35, %s1884_s19  ;;  %866 = vrot.lane.b32.xlu2 %v861_v57, %s1881_s25  ;;  %v523_v37 = vadd.f32 %v521_v33, %v514_v34  ;;  %v975_v35 = vmul.f32 %v973_v2, %v2364_v52 }
 0x180   : > { %864 = vrot.lane.b32.xlu1 %v860_v36, %s1881_s25 }
 0x181   : > { %v564_v38 = vpop.permute.xlu0 %563  ;;  %v607_v28 = vpop.permute.xlu2 %606  ;;  %v538_v39 = vadd.f32 %v534_v0, %v523_v37 }
 0x182   : > { %v532_v40 = vpop.permute.xlu1 %531 }
 0x183   : > { %v537_v43 = vadd.f32 %v532_v40, %v522_v26  ;;  %v648_v26 = vstv %s2391_s6  ;;  %s2427_s6 = sld [smem:[#allocation8 + %s1085_s7]] }
 0x184   : > { %v649_v34 = vmul.f32 %v648_v26, %v2229_v45  ;;  %v1003_v45 = vstv %s1002_s4  ;;  %v650_v40 = vmul.f32 %v648_v26, %v2215_v30  ;;  %s1130_s4 = sadd.s32 61, %s2050_s22  ;;  %s1101_s7 = sld [smem:[#allocation8 + %s1100_s21]] }
 0x185   : > { %v552_v44 = vadd.f32 %v547_v24, %v537_v43  ;;  %s2450_s29 = sld [smem:[#allocation8 + %s1130_s4]]  ;;  %s1145_s4 = sadd.s32 62, %s2050_s22 }
 0x187   : > { %933 = vrot.lane.b32.xlu0 %v929_v14, %s1878_s30  ;;  %894 = vrot.lane.b32.xlu2 %v890_v46, %s1884_s19  ;;  %v567_v48 = vadd.f32 %v562_v12, %v552_v44  ;;  %v1005_v14 = vmul.f32 %v1003_v45, %v2364_v52  ;;  %v1004_v46 = vmul.f32 %v1003_v45, %v2354_v41 }
 0x188   : > { %881 = vrot.lane.b32.xlu1 %v876_v47, %s1882_s8 }
 0x189   : > { %v592_v49 = vpop.permute.xlu0 %591  ;;  %v624_v50 = vpop.permute.xlu2 %623 }
 0x18a   : > { %v549_v51 = vpop.permute.xlu1 %548 }
 0x18b   : > { %v553_v55 = vadd.f32 %v549_v51, %v538_v39  ;;  %v1042_v39 = vstv %s2401_s27  ;;  %v2429_v51 = vld [vmem:[#allocation2 + $0x6] sm:$0xff]  ;;  %s2440_s27 = sld [smem:[#allocation8 + %s1115_s23]] }
 0x18d   : > { %v568_v56 = vadd.f32 %v564_v38, %v553_v55 }
 0x18f   : > { %950 = vrot.lane.b32.xlu0 %v945_v58, %s1877_s5  ;;  %920 = vrot.lane.b32.xlu2 %v915_v59, %s1879_s9  ;;  %v583_v61 = vadd.f32 %v579_v25, %v568_v56  ;;  %v1018_v25 = vstv %s2388_s10  ;;  %s1055_s10 = sadd.s32 56, %s2050_s22  ;;  %v1073_v56 = vmul.f32 %v1072_v53, %v2429_v51  ;;  %v1043_v58 = vmul.f32 %v1042_v39, %v2429_v51 }
 0x190   : > { %918 = vrot.lane.b32.xlu1 %v914_v60, %s1879_s9  ;;  %v1019_v31 = vmul.f32 %v1018_v25, %v2354_v41  ;;  %s1056_s2 = sld [smem:[#allocation8 + %s1055_s10]]  ;;  %v1020_v59 = vmul.f32 %v1018_v25, %v2364_v52  ;;  %s775_s10 = sadd.s32 36, %s2050_s22  ;;  %v1102_v25 = vstv %s1101_s7 }
 0x191   : > { %v609_v63 = vpop.permute.xlu0 %608  ;;  %v661_v0 = vpop.permute.xlu2 %660  ;;  %v1117_v13 = vstv %s2440_s27  ;;  %s1184_s27 = sadd.s32 65, %s2050_s22  ;;  %s1214_s7 = sadd.s32 67, %s2050_s22 }
 0x192   : > { %v577_v1 = vpop.permute.xlu1 %576  ;;  %s2476_s21 = sld [smem:[#allocation8 + %s1184_s27]] }
 0x193   : > { %v582_v3 = vadd.f32 %v577_v1, %v567_v48  ;;  %v1087_v1 = vstv %s2427_s6  ;;  %s2457_s6 = sld [smem:[#allocation8 + %s775_s10]] }
 0x194   : > { %s2492_s10 = sld [smem:[#allocation8 + %s1214_s7]] }
 0x195   : > { %v597_v4 = vadd.f32 %v592_v49, %v582_v3 }
 0x196   : > { %v1057_v2 = vstv %s1056_s2  ;;  %s1169_s2 = sadd.s32 64, %s2050_s22 }
 0x197   : > { %978 = vrot.lane.b32.xlu0 %v974_v5, %s1883_s11  ;;  %948 = vrot.lane.b32.xlu2 %v944_v6, %s1877_s5  ;;  %v612_v8 = vadd.f32 %v607_v28, %v597_v4  ;;  %v2413_v28 = vld [vmem:[#allocation2 + $0xe] sm:$0xff]  ;;  %s2464_s23 = sld [smem:[#allocation8 + %s1169_s2]]  ;;  %s1199_s2 = sadd.s32 66, %s2050_s22 }
 0x198   : > { %935 = vrot.lane.b32.xlu1 %v930_v7, %s1878_s30  ;;  %v1044_v44 = vmul.f32 %v1042_v39, %v2413_v28  ;;  %v1089_v5 = vmul.f32 %v1087_v1, %v2413_v28  ;;  %v1059_v6 = vmul.f32 %v1057_v2, %v2413_v28  ;;  %v1058_v7 = vmul.f32 %v1057_v2, %v2429_v51  ;;  %v2478_v39 = vld [vmem:[#allocation2 + $0x7] sm:$0xff]  ;;  %s1200_s27 = sld [smem:[#allocation8 + %s1199_s2]] }
 0x199   : > { %v637_v9 = vpop.permute.xlu0 %636  ;;  %v678_v11 = vpop.permute.xlu2 %677 }
 0x19a   : > { %v594_v12 = vpop.permute.xlu1 %593 }
 0x19b   : > { %v598_v16 = vadd.f32 %v594_v12, %v583_v61 }
 0x19d   : > { %v613_v17 = vadd.f32 %v609_v63, %v598_v16  ;;  %v1171_v45 = vstv %s2464_s23 }
 0x19f   : > { %995 = vrot.lane.b32.xlu0 %v990_v18, %s1881_s25  ;;  %965 = vrot.lane.b32.xlu2 %v960_v19, %s1880_s28  ;;  %v628_v21 = vadd.f32 %v624_v50, %v613_v17  ;;  %v1118_v17 = vmul.f32 %v1117_v13, %v2429_v51  ;;  %v1088_v18 = vmul.f32 %v1087_v1, %v2429_v51  ;;  %v1216_v1 = vstv %s2492_s10  ;;  %s1274_s10 = sadd.s32 71, %s2050_s22 }
 0x1a0   : > { %963 = vrot.lane.b32.xlu1 %v959_v20, %s1880_s28  ;;  %v1074_v19 = vmul.f32 %v1072_v53, %v2413_v28  ;;  %s2526_s2 = sld [smem:[#allocation8 + %s1274_s10]] }
 0x1a1   : > { %v663_v22 = vpop.permute.xlu0 %662  ;;  %v706_v23 = vpop.permute.xlu2 %705 }
 0x1a2   : > { %v622_v24 = vpop.permute.xlu1 %621 }
 0x1a3   : > { %v627_v27 = vadd.f32 %v622_v24, %v612_v8  ;;  %v1132_v24 = vstv %s2450_s29  ;;  %s1146_s29 = sld [smem:[#allocation8 + %s1145_s4]]  ;;  %s1259_s4 = sadd.s32 70, %s2050_s22 }
 0x1a5   : > { %v642_v29 = vadd.f32 %v637_v9, %v627_v27 }
 0x1a7   : > { %1023 = vrot.lane.b32.xlu0 %v1019_v31, %s1884_s19  ;;  %993 = vrot.lane.b32.xlu2 %v989_v32, %s1881_s25  ;;  %v651_v57 = vadd.f32 %v649_v34, %v642_v29  ;;  %v1134_v29 = vmul.f32 %v1132_v24, %v2413_v28  ;;  %v1104_v31 = vmul.f32 %v1102_v25, %v2413_v28  ;;  %v777_v34 = vstv %s2457_s6  ;;  %s1229_s6 = sadd.s32 68, %s2050_s22 }
 0x1a8   : > { %980 = vrot.lane.b32.xlu1 %v975_v35, %s1883_s11  ;;  %v1103_v32 = vmul.f32 %v1102_v25, %v2429_v51  ;;  %s2502_s23 = sld [smem:[#allocation8 + %s1229_s6]]  ;;  %s1244_s6 = sadd.s32 69, %s2050_s22 }
 0x1a9   : > { %v691_v33 = vpop.permute.xlu0 %690  ;;  %v723_v36 = vpop.permute.xlu2 %722  ;;  %v666_v37 = vadd.f32 %v661_v0, %v651_v57  ;;  %v779_v57 = vmul.f32 %v777_v34, %v2291_v42  ;;  %v1172_v42 = vmul.f32 %v1171_v45, %v2478_v39  ;;  %v1147_v53 = vstv %s1146_s29  ;;  %s2514_s29 = sld [smem:[#allocation8 + %s1259_s4]] }
 0x1aa   : > { %v639_v38 = vpop.permute.xlu1 %638 }
 0x1ab   : > { %v643_v62 = vadd.f32 %v639_v38, %v628_v21 }
 0x1ad   : > { %v652_v43 = vadd.f32 %v650_v40, %v643_v62  ;;  %v778_v40 = vmul.f32 %v777_v34, %v2278_v10 }
 0x1af   : > { %1049 = vrot.lane.b32.xlu0 %v1044_v44, %s1879_s9  ;;  %1010 = vrot.lane.b32.xlu2 %v1005_v14, %s1882_s8  ;;  %v667_v47 = vadd.f32 %v663_v22, %v652_v43  ;;  %v1133_v44 = vmul.f32 %v1132_v24, %v2429_v51  ;;  %v1119_v14 = vmul.f32 %v1117_v13, %v2413_v28  ;;  %v1201_v13 = vstv %s1200_s27  ;;  %s1313_s27 = sadd.s32 74, %s2050_s22 }
 0x1b0   : > { %1008 = vrot.lane.b32.xlu1 %v1004_v46, %s1882_s8  ;;  %v1261_v24 = vstv %s2514_s29  ;;  %s2539_s4 = sld [smem:[#allocation8 + %s1313_s27]]  ;;  %s1298_s29 = sadd.s32 73, %s2050_s22 }
 0x1b1   : > { %v708_v48 = vpop.permute.xlu0 %707  ;;  %v751_v30 = vpop.permute.xlu2 %750  ;;  %v682_v49 = vadd.f32 %v678_v11, %v667_v47  ;;  %s1299_s10 = sld [smem:[#allocation8 + %s1298_s29]]  ;;  %s1343_s27 = sadd.s32 76, %s2050_s22 }
 0x1b2   : > { %v676_v50 = vpop.permute.xlu1 %675  ;;  %s1403_s29 = sadd.s32 80, %s2050_s22 }
 0x1b3   : > { %v681_v54 = vadd.f32 %v676_v50, %v666_v37  ;;  %v1186_v50 = vstv %s2476_s21  ;;  %s904_s21 = sadd.s32 45, %s2050_s22 }
 0x1b4   : > { %s2516_s7 = sld [smem:[#allocation8 + %s904_s21]]  ;;  %s1328_s21 = sadd.s32 75, %s2050_s22 }
 0x1b5   : > { %v696_v55 = vadd.f32 %v691_v33, %v681_v54 }
 0x1b7   : > { %1077 = vrot.lane.b32.xlu0 %v1073_v56, %s1877_s5  ;;  %1047 = vrot.lane.b32.xlu2 %v1043_v58, %s1879_s9  ;;  %v711_v60 = vadd.f32 %v706_v23, %v696_v55  ;;  %v1149_v58 = vmul.f32 %v1147_v53, %v2413_v28 }
 0x1b8   : > { %1025 = vrot.lane.b32.xlu1 %v1020_v59, %s1884_s19  ;;  %v1148_v59 = vmul.f32 %v1147_v53, %v2429_v51 }
 0x1b9   : > { %v736_v61 = vpop.permute.xlu0 %735  ;;  %v768_v63 = vpop.permute.xlu2 %767 }
 0x1ba   : > { %v693_v0 = vpop.permute.xlu1 %692 }
 0x1bb   : > { %v697_v3 = vadd.f32 %v693_v0, %v682_v49  ;;  %v2489_v49 = vld [vmem:[#allocation2 + $0xf] sm:$0xff] }
 0x1bc   : > { %v1188_v56 = vmul.f32 %v1186_v50, %v2489_v49 }
 0x1bd   : > { %v712_v4 = vadd.f32 %v708_v48, %v697_v3 }
 0x1bf   : > { %1094 = vrot.lane.b32.xlu0 %v1089_v5, %s1880_s28  ;;  %1064 = vrot.lane.b32.xlu2 %v1059_v6, %s1878_s30  ;;  %v727_v8 = vadd.f32 %v723_v36, %v712_v4  ;;  %v1217_v4 = vmul.f32 %v1216_v1, %v2478_v39  ;;  %v1187_v5 = vmul.f32 %v1186_v50, %v2478_v39 }
 0x1c0   : > { %1062 = vrot.lane.b32.xlu1 %v1058_v7, %s1878_s30  ;;  %v1173_v6 = vmul.f32 %v1171_v45, %v2489_v49 }
 0x1c1   : > { %v753_v9 = vpop.permute.xlu0 %752  ;;  %v805_v11 = vpop.permute.xlu2 %804 }
 0x1c2   : > { %v721_v12 = vpop.permute.xlu1 %720 }
 0x1c3   : > { %v726_v15 = vadd.f32 %v721_v12, %v711_v60  ;;  %v1231_v12 = vstv %s2502_s23  ;;  %s1245_s23 = sld [smem:[#allocation8 + %s1244_s6]]  ;;  %s1358_s6 = sadd.s32 77, %s2050_s22 }
 0x1c5   : > { %v741_v16 = vadd.f32 %v736_v61, %v726_v15 }
 0x1c7   : > { %1122 = vrot.lane.b32.xlu0 %v1118_v17, %s1881_s25  ;;  %1092 = vrot.lane.b32.xlu2 %v1088_v18, %s1880_s28  ;;  %v756_v20 = vadd.f32 %v751_v30, %v741_v16  ;;  %v1233_v17 = vmul.f32 %v1231_v12, %v2489_v49  ;;  %v1203_v18 = vmul.f32 %v1201_v13, %v2489_v49 }
 0x1c8   : > { %1079 = vrot.lane.b32.xlu1 %v1074_v19, %s1877_s5  ;;  %v1202_v19 = vmul.f32 %v1201_v13, %v2478_v39 }
 0x1c9   : > { %v790_v21 = vpop.permute.xlu0 %789  ;;  %v822_v22 = vpop.permute.xlu2 %821  ;;  %v1246_v45 = vstv %s1245_s23  ;;  %s1373_s23 = sadd.s32 78, %s2050_s22 }
 0x1ca   : > { %v738_v23 = vpop.permute.xlu1 %737 }
 0x1cb   : > { %v742_v26 = vadd.f32 %v738_v23, %v727_v8 }
 0x1cd   : > { %v757_v27 = vadd.f32 %v753_v9, %v742_v26  ;;  %v906_v26 = vstv %s2516_s7  ;;  %s2550_s7 = sld [smem:[#allocation8 + %s1328_s21]] }
 0x1ce   : > { %v907_v34 = vmul.f32 %v906_v26, %v2354_v41  ;;  %v1248_v41 = vmul.f32 %v1246_v45, %v2489_v49  ;;  %s1344_s21 = sld [smem:[#allocation8 + %s1343_s27]] }
 0x1cf   : > { %1139 = vrot.lane.b32.xlu0 %v1134_v29, %s1882_s8  ;;  %1109 = vrot.lane.b32.xlu2 %v1104_v31, %s1883_s11  ;;  %v772_v35 = vadd.f32 %v768_v63, %v757_v27  ;;  %v1262_v29 = vmul.f32 %v1261_v24, %v2478_v39  ;;  %v1232_v31 = vmul.f32 %v1231_v12, %v2478_v39 }
 0x1d0   : > { %1107 = vrot.lane.b32.xlu1 %v1103_v32, %s1883_s11  ;;  %v1218_v32 = vmul.f32 %v1216_v1, %v2489_v49  ;;  %v1300_v1 = vstv %s1299_s10 }
 0x1d1   : > { %v807_v33 = vpop.permute.xlu0 %806  ;;  %v850_v36 = vpop.permute.xlu2 %849  ;;  %v781_v37 = vadd.f32 %v779_v57, %v772_v35 }
 0x1d2   : > { %v766_v38 = vpop.permute.xlu1 %765 }
 0x1d3   : > { %v771_v62 = vadd.f32 %v766_v38, %v756_v20  ;;  %v1276_v38 = vstv %s2526_s2  ;;  %s2565_s2 = sld [smem:[#allocation8 + %s1358_s6]] }
 0x1d5   : > { %v780_v43 = vadd.f32 %v778_v40, %v771_v62 }
 0x1d7   : > { %1176 = vrot.lane.b32.xlu0 %v1172_v42, %s1879_s9  ;;  %1137 = vrot.lane.b32.xlu2 %v1133_v44, %s1882_s8  ;;  %v795_v46 = vadd.f32 %v790_v21, %v780_v43  ;;  %v1278_v43 = vmul.f32 %v1276_v38, %v2489_v49  ;;  %v908_v42 = vmul.f32 %v906_v26, %v2364_v52  ;;  %v1315_v52 = vstv %s2539_s4  ;;  %s2575_s4 = sld [smem:[#allocation8 + %s1373_s23]] }
 0x1d8   : > { %1124 = vrot.lane.b32.xlu1 %v1119_v14, %s1881_s25  ;;  %v1247_v44 = vmul.f32 %v1246_v45, %v2478_v39 }
 0x1d9   : > { %v835_v47 = vpop.permute.xlu0 %834  ;;  %v867_v10 = vpop.permute.xlu2 %866  ;;  %v810_v48 = vadd.f32 %v805_v11, %v795_v46  ;;  %v1360_v12 = vstv %s2565_s2 }
 0x1da   : > { %v792_v30 = vpop.permute.xlu1 %791 }
 0x1db   : > { %v796_v54 = vadd.f32 %v792_v30, %v781_v37  ;;  %v2552_v30 = vld [vmem:[#allocation2 + $0x8] sm:$0xff] }
 0x1dd   : > { %v811_v55 = vadd.f32 %v807_v33, %v796_v54  ;;  %v1316_v54 = vmul.f32 %v1315_v52, %v2552_v30 }
 0x1df   : > { %1193 = vrot.lane.b32.xlu0 %v1188_v56, %s1878_s30  ;;  %1154 = vrot.lane.b32.xlu2 %v1149_v58, %s1884_s19  ;;  %v826_v60 = vadd.f32 %v822_v22, %v811_v55  ;;  %v1277_v55 = vmul.f32 %v1276_v38, %v2478_v39  ;;  %v1263_v56 = vmul.f32 %v1261_v24, %v2489_v49 }
 0x1e0   : > { %1152 = vrot.lane.b32.xlu1 %v1148_v59, %s1884_s19 }
 0x1e1   : > { %v852_v61 = vpop.permute.xlu0 %851  ;;  %v895_v63 = vpop.permute.xlu2 %894 }
 0x1e2   : > { %v820_v0 = vpop.permute.xlu1 %819 }
 0x1e3   : > { %v825_v2 = vadd.f32 %v820_v0, %v810_v48  ;;  %v1330_v0 = vstv %s2550_s7  ;;  %s2586_s7 = sld [smem:[#allocation8 + %s1403_s29]]  ;;  %s1434_s29 = scalar_lea.sflag [#allocation5], %s2027_s24 }
 0x1e5   : > { %v840_v3 = vadd.f32 %v835_v47, %v825_v2 }
 0x1e7   : > { %1221 = vrot.lane.b32.xlu0 %v1217_v4, %s1880_s28  ;;  %1191 = vrot.lane.b32.xlu2 %v1187_v5, %s1878_s30  ;;  %v855_v7 = vadd.f32 %v850_v36, %v840_v3 }
 0x1e8   : > { %1178 = vrot.lane.b32.xlu1 %v1173_v6, %s1879_s9  ;;  %v1301_v6 = vmul.f32 %v1300_v1, %v2552_v30 }
 0x1e9   : > { %v880_v8 = vpop.permute.xlu0 %879  ;;  %v921_v9 = vpop.permute.xlu2 %920 }
 0x1ea   : > { %v837_v11 = vpop.permute.xlu1 %836 }
 0x1eb   : > { %v841_v15 = vadd.f32 %v837_v11, %v826_v60 }
 0x1ed   : > { %v856_v16 = vadd.f32 %v852_v61, %v841_v15 }
 0x1ef   : > { %1238 = vrot.lane.b32.xlu0 %v1233_v17, %s1883_s11  ;;  %1208 = vrot.lane.b32.xlu2 %v1203_v18, %s1877_s5  ;;  %v871_v20 = vadd.f32 %v867_v10, %v856_v16  ;;  %v1361_v16 = vmul.f32 %v1360_v12, %v2552_v30  ;;  %v1331_v17 = vmul.f32 %v1330_v0, %v2552_v30 }
 0x1f0   : > { %1206 = vrot.lane.b32.xlu1 %v1202_v19, %s1877_s5 }
 0x1f1   : > { %v897_v21 = vpop.permute.xlu0 %896  ;;  %v949_v22 = vpop.permute.xlu2 %948 }
 0x1f2   : > { %v865_v23 = vpop.permute.xlu1 %864 }
 0x1f3   : > { %v870_v25 = vadd.f32 %v865_v23, %v855_v7  ;;  %v1345_v23 = vstv %s1344_s21 }
 0x1f5   : > { %v885_v27 = vadd.f32 %v880_v8, %v870_v25 }
 0x1f7   : > { %1266 = vrot.lane.b32.xlu0 %v1262_v29, %s1882_s8  ;;  %1236 = vrot.lane.b32.xlu2 %v1232_v31, %s1883_s11  ;;  %v900_v35 = vadd.f32 %v895_v63, %v885_v27  ;;  %v2562_v63 = vld [vmem:[#allocation2 + $0x10] sm:$0xff]  ;;  %v1346_v31 = vmul.f32 %v1345_v23, %v2552_v30 }
 0x1f8   : > { %1223 = vrot.lane.b32.xlu1 %v1218_v32, %s1880_s28  ;;  %v1332_v4 = vmul.f32 %v1330_v0, %v2562_v63  ;;  %v1302_v5 = vmul.f32 %v1300_v1, %v2562_v63  ;;  %v1317_v18 = vmul.f32 %v1315_v52, %v2562_v63  ;;  %v1347_v29 = vmul.f32 %v1345_v23, %v2562_v63 }
 0x1f9   : > { %v934_v57 = vpop.permute.xlu0 %933  ;;  %v966_v33 = vpop.permute.xlu2 %965  ;;  %v909_v36 = vadd.f32 %v907_v34, %v900_v35 }
 0x1fa   : > { %v882_v37 = vpop.permute.xlu1 %881 }
 0x1fb   : > { %v886_v40 = vadd.f32 %v882_v37, %v871_v20 }
 0x1fd   : > { %v901_v62 = vadd.f32 %v897_v21, %v886_v40 }
 0x1ff   : > { %1283 = vrot.lane.b32.xlu0 %v1278_v43, %s1884_s19  ;;  %1253 = vrot.lane.b32.xlu2 %v1248_v41, %s1881_s25  ;;  %v910_v14 = vadd.f32 %v908_v42, %v901_v62  ;;  %v1362_v43 = vmul.f32 %v1360_v12, %v2562_v63 }
 0x200   : > { %1251 = vrot.lane.b32.xlu1 %v1247_v44, %s1881_s25 }
 0x201   : > { %v951_v46 = vpop.permute.xlu0 %950  ;;  %v994_v47 = vpop.permute.xlu2 %993  ;;  %v925_v10 = vadd.f32 %v921_v9, %v910_v14 }
 0x202   : > { %v919_v48 = vpop.permute.xlu1 %918 }
 0x203   : > { %v924_v50 = vadd.f32 %v919_v48, %v909_v36 }
 0x205   : > { %v939_v53 = vadd.f32 %v934_v57, %v924_v50  ;;  %v1405_v57 = vstv %s2586_s7 }
 0x206   : > { %v1406_v38 = vmul.f32 %v1405_v57, %v2552_v30 }
 0x207   : > { %1320 = vrot.lane.b32.xlu0 %v1316_v54, %s1878_s30  ;;  %1281 = vrot.lane.b32.xlu2 %v1277_v55, %s1884_s19  ;;  %v954_v58 = vadd.f32 %v949_v22, %v939_v53  ;;  %v1375_v22 = vstv %s2575_s4 }
 0x208   : > { %1268 = vrot.lane.b32.xlu1 %v1263_v56, %s1882_s8  ;;  %v1377_v27 = vmul.f32 %v1375_v22, %v2562_v63  ;;  %v1376_v45 = vmul.f32 %v1375_v22, %v2552_v30 }
 0x209   : > { %v979_v59 = vpop.permute.xlu0 %978  ;;  %v1011_v60 = vpop.permute.xlu2 %1010 }
 0x20a   : > { %v936_v61 = vpop.permute.xlu1 %935 }
 0x20b   : > { %v940_v2 = vadd.f32 %v936_v61, %v925_v10 }
 0x20d   : > { %v955_v3 = vadd.f32 %v951_v46, %v940_v2 }
 0x20f   : > { %1337 = vrot.lane.b32.xlu0 %v1332_v4, %s1877_s5  ;;  %1307 = vrot.lane.b32.xlu2 %v1302_v5, %s1879_s9  ;;  %v970_v7 = vadd.f32 %v966_v33, %v955_v3 }
 0x210   : > { %1305 = vrot.lane.b32.xlu1 %v1301_v6, %s1879_s9  ;;  %s1033_s9 = sadd.s32 54, %s2050_s22 }
 0x211   : > { %v996_v8 = vpop.permute.xlu0 %995  ;;  %v1048_v9 = vpop.permute.xlu2 %1047  ;;  %s2589_s10 = sld [smem:[#allocation8 + %s1033_s9]] }
 0x212   : > { %v964_v11 = vpop.permute.xlu1 %963 }
 0x213   : > { %v969_v13 = vadd.f32 %v964_v11, %v954_v58 }
 0x215   : > { %v984_v15 = vadd.f32 %v979_v59, %v969_v13 }
 0x217   : > { %1365 = vrot.lane.b32.xlu0 %v1361_v16, %s1883_s11  ;;  %1335 = vrot.lane.b32.xlu2 %v1331_v17, %s1877_s5  ;;  %v999_v19 = vadd.f32 %v994_v47, %v984_v15  ;;  %s1388_s5 = sadd.s32 79, %s2050_s22  ;;  %v1035_v33 = vstv %s2589_s10 }
 0x218   : > { %1322 = vrot.lane.b32.xlu1 %v1317_v18, %s1878_s30  ;;  %s1389_s30 = sld [smem:[#allocation8 + %s1388_s5]]  ;;  %v1036_v40 = vmul.f32 %v1035_v33, %v2429_v51  ;;  %v1037_v47 = vmul.f32 %v1035_v33, %v2413_v28  ;;  %v1407_v28 = vmul.f32 %v1405_v57, %v2562_v63 }
 0x219   : > { %v1024_v20 = vpop.permute.xlu0 %1023  ;;  %v1065_v25 = vpop.permute.xlu2 %1064 }
 0x21a   : > { %v981_v21 = vpop.permute.xlu1 %980 }
 0x21b   : > { %v985_v24 = vadd.f32 %v981_v21, %v970_v7 }
 0x21d   : > { %v1000_v26 = vadd.f32 %v996_v8, %v985_v24 }
 0x21e   : > { %v1390_v46 = vstv %s1389_s30 }
 0x21f   : > { %1382 = vrot.lane.b32.xlu0 %v1377_v27, %s1881_s25  ;;  %1352 = vrot.lane.b32.xlu2 %v1347_v29, %s1880_s28  ;;  %v1015_v32 = vadd.f32 %v1011_v60, %v1000_v26  ;;  %v1392_v51 = vmul.f32 %v1390_v46, %v2562_v63  ;;  %v1391_v52 = vmul.f32 %v1390_v46, %v2552_v30 }
 0x220   : > { %1350 = vrot.lane.b32.xlu1 %v1346_v31, %s1880_s28  ;;  %s1162_s28 = sadd.s32 63, %s2050_s22 }
 0x221   : > { %v1050_v34 = vpop.permute.xlu0 %1049  ;;  %v1093_v62 = vpop.permute.xlu2 %1092 }
 0x222   : > { %v1009_v35 = vpop.permute.xlu1 %1008 }
 0x223   : > { %v1014_v36 = vadd.f32 %v1009_v35, %v999_v19 }
 0x225   : > { %v1029_v37 = vadd.f32 %v1024_v20, %v1014_v36 }
 0x227   : > { %1410 = vrot.lane.b32.xlu0 %v1406_v38, %s1884_s19  ;;  %1380 = vrot.lane.b32.xlu2 %v1376_v45, %s1881_s25  ;;  %v1038_v41 = vadd.f32 %v1036_v40, %v1029_v37  ;;  %s1163_s25 = sld [smem:[#allocation8 + %s1162_s28]] }
 0x228   : > { %1367 = vrot.lane.b32.xlu1 %v1362_v43, %s1883_s11 }
 0x229   : > { %v1078_v42 = vpop.permute.xlu0 %1077  ;;  %v1053_v44 = vadd.f32 %v1048_v9, %v1038_v41  ;;  %v1110_v53 = vpop.permute.xlu2 %1109 }
 0x22a   : > { %v1026_v14 = vpop.permute.xlu1 %1025 }
 0x22b   : > { %v1030_v10 = vadd.f32 %v1026_v14, %v1015_v32 }
 0x22d   : > { %v1039_v48 = vadd.f32 %v1037_v47, %v1030_v10  ;;  %v1164_v13 = vstv %s1163_s25 }
 0x22e   : > { %v1166_v19 = vmul.f32 %v1164_v13, %v2489_v49  ;;  %v1165_v24 = vmul.f32 %v1164_v13, %v2478_v39 }
 0x22f   : > { %1397 = vrot.lane.b32.xlu2 %v1392_v51, %s1882_s8  ;;  %v1054_v50 = vadd.f32 %v1050_v34, %v1039_v48 }
 0x230   : > { %1395 = vrot.lane.b32.xlu1 %v1391_v52, %s1882_s8  ;;  %s1291_s8 = sadd.s32 72, %s2050_s22  ;;  %s1581_s22 = sshll.u32 %s1853_s15, 1 }
 0x231   : > { %v1095_v54 = vpop.permute.xlu0 %1094  ;;  %v1069_v55 = vadd.f32 %v1065_v25, %v1054_v50  ;;  %v1138_v61 = vpop.permute.xlu2 %1137  ;;  %s1292_s11 = sld [smem:[#allocation8 + %s1291_s8]]  ;;  %s235_s15 = scalar_lea.vmem [#allocation10], %s1576_s1 }
 0x232   : > { %v1063_v56 = vpop.permute.xlu1 %1062  ;;  %s1783_s1 = scalar_lea.hbm %s2671_s3, 128 }
 0x233   : > { %v1068_v58 = vadd.f32 %v1063_v56, %v1053_v44 }
 0x235   : > { %v1083_v59 = vadd.f32 %v1078_v42, %v1068_v58 }
 0x237   : > { %v1098_v6 = vadd.f32 %v1093_v62, %v1083_v59  ;;  %v1293_v46 = vstv %s1292_s11 }
 0x238   : > { %1412 = vrot.lane.b32.xlu1 %v1407_v28, %s1884_s19  ;;  %v1294_v51 = vmul.f32 %v1293_v46, %v2552_v30  ;;  %v1295_v59 = vmul.f32 %v1293_v46, %v2562_v63  ;;  %s1582_s19 = sshll.u32 %s1857_s16, 3  ;;  %s1448_s16 = sshll.u32 %s235_s15, 4  ;;  %s1449_s16 = int_to_ptr.vmem [resolvable:$true] %s1448_s16 }
 0x239   : > { %v1123_v60 = vpop.permute.xlu0 %1122  ;;  %v1155_v5 = vpop.permute.xlu2 %1154  ;;  %s1445_s6 = sadd.s32 %s1582_s19, %s1581_s22 }
 0x23a   : > { %v1080_v0 = vpop.permute.xlu1 %1079  ;;  %s1583_s2 = sshll.u32 %s1445_s6, 3 }
 0x23b   : > { %v1084_v1 = vadd.f32 %v1080_v0, %v1069_v55  ;;  %s1447_s4 = scalar_lea.hbm %s2671_s3, %s1583_s2 }
 0x23c   : > { %s1450_s21 = sshll.u32 %s1447_s4, 4  ;;  %s1451_s21 = int_to_ptr.hbm [resolvable:$true] %s1450_s21 }
 0x23d   : > { %v1099_v2 = vadd.f32 %v1095_v54, %v1084_v1  ;;  %s1777_s9 = sshra.s32 %s1451_s21, 4  ;;  %s1778_s9 = int_to_ptr.hbm [resolvable:$true] %s1777_s9 }
 0x23e   : > { %s1779_s7 = scalar_lea.hbm %s1778_s9, 16  ;;  %p1784_p11 = scmp.lt.s32.totalorder %s1778_s9, %s2671_s3 }
 0x23f   : > { %v1114_v9 = vadd.f32 %v1110_v53, %v1099_v2  ;;  %p1780_p3 = scmp.ne.s32.totalorder %s1778_s9, %s1779_s7  ;;  %p1785_p12 = scmp.lt.s32.totalorder %s1783_s1, %s1779_s7 }
 0x241   : > { %v1140_v3 = vpop.permute.xlu0 %1139  ;;  %v1192_v17 = vpop.permute.xlu2 %1191  ;;  %p1781_p7 = pnand %p1780_p3, %p1969_p8  ;;  %p1786_p13 = por %p1785_p12, %p1784_p11 }
 0x242   : > { %v1108_v4 = vpop.permute.xlu1 %1107 }
 0x243   : > { %v1113_v7 = vadd.f32 %v1108_v4, %v1098_v6  ;;  %p1782_p10 = pneg %p1781_p7 }
 0x245   : > { %v1128_v15 = vadd.f32 %v1123_v60, %v1113_v7  ;;  %p1787_p0 = pnand %p1786_p13, %p1782_p10 }
 0x247   : > { %v1143_v21 = vadd.f32 %v1138_v61, %v1128_v15 }
 0x249   : > { %v1177_v8 = vpop.permute.xlu0 %1176  ;;  %v1209_v27 = vpop.permute.xlu2 %1208 }
 0x24a   : > { %v1125_v11 = vpop.permute.xlu1 %1124 }
 0x24b   : > { %v1129_v12 = vadd.f32 %v1125_v11, %v1114_v9 }
 0x24d   : > { %v1144_v16 = vadd.f32 %v1140_v3, %v1129_v12 }
 0x24f   : > { %v1159_v18 = vadd.f32 %v1155_v5, %v1144_v16 }
 0x251   : > { %v1194_v20 = vpop.permute.xlu0 %1193  ;;  %v1168_v22 = vadd.f32 %v1166_v19, %v1159_v18  ;;  %v1237_v34 = vpop.permute.xlu2 %1236 }
 0x252   : > { %v1153_v23 = vpop.permute.xlu1 %1152 }
 0x253   : > { %v1158_v25 = vadd.f32 %v1153_v23, %v1143_v21 }
 0x255   : > { %v1167_v26 = vadd.f32 %v1165_v24, %v1158_v25 }
 0x257   : > { %v1182_v57 = vadd.f32 %v1177_v8, %v1167_v26 }
 0x259   : > { %v1222_v29 = vpop.permute.xlu0 %1221  ;;  %v1197_v36 = vadd.f32 %v1192_v17, %v1182_v57  ;;  %v1254_v40 = vpop.permute.xlu2 %1253 }
 0x25a   : > { %v1179_v31 = vpop.permute.xlu1 %1178 }
 0x25b   : > { %v1183_v33 = vadd.f32 %v1179_v31, %v1168_v22 }
 0x25d   : > { %v1198_v45 = vadd.f32 %v1194_v20, %v1183_v33  ;;  %v1426_v33 = vld [vmem:[%s2033_s17] sm:$0xff] }
 0x25f   : > { %v1213_v39 = vadd.f32 %v1209_v27, %v1198_v45 }
 0x261   : > { %v1239_v32 = vpop.permute.xlu0 %1238  ;;  %v1282_v48 = vpop.permute.xlu2 %1281 }
 0x262   : > { %v1207_v35 = vpop.permute.xlu1 %1206 }
 0x263   : > { %v1212_v37 = vadd.f32 %v1207_v35, %v1197_v36 }
 0x265   : > { %v1227_v62 = vadd.f32 %v1222_v29, %v1212_v37 }
 0x267   : > { %v1242_v41 = vadd.f32 %v1237_v34, %v1227_v62 }
 0x269   : > { %v1267_v49 = vpop.permute.xlu0 %1266  ;;  %v1308_v60 = vpop.permute.xlu2 %1307 }
 0x26a   : > { %v1224_v38 = vpop.permute.xlu1 %1223 }
 0x26b   : > { %v1228_v43 = vadd.f32 %v1224_v38, %v1213_v39  ;;  %v1427_v38 = vld [vmem:[%s2033_s17 + $0x8] sm:$0xff] }
 0x26d   : > { %v1243_v47 = vadd.f32 %v1239_v32, %v1228_v43 }
 0x26f   : > { %v1258_v50 = vadd.f32 %v1254_v40, %v1243_v47 }
 0x271   : > { %v1284_v42 = vpop.permute.xlu0 %1283  ;;  %v1336_v1 = vpop.permute.xlu2 %1335 }
 0x272   : > { %v1252_v44 = vpop.permute.xlu1 %1251 }
 0x273   : > { %v1257_v14 = vadd.f32 %v1252_v44, %v1242_v41 }
 0x275   : > { %v1272_v10 = vadd.f32 %v1267_v49, %v1257_v14 }
 0x277   : > { %v1287_v52 = vadd.f32 %v1282_v48, %v1272_v10 }
 0x279   : > { %v1296_v53 = vadd.f32 %v1294_v51, %v1287_v52  ;;  %v1321_v56 = vpop.permute.xlu0 %1320  ;;  %v1353_v30 = vpop.permute.xlu2 %1352 }
 0x27a   : > { %v1269_v54 = vpop.permute.xlu1 %1268 }
 0x27b   : > { %v1273_v55 = vadd.f32 %v1269_v54, %v1258_v50 }
 0x27d   : > { %v1288_v58 = vadd.f32 %v1284_v42, %v1273_v55 }
 0x27f   : > { %v1297_v28 = vadd.f32 %v1295_v59, %v1288_v58 }
 0x281   : > { %v1338_v0 = vpop.permute.xlu0 %1337  ;;  %v1312_v7 = vadd.f32 %v1308_v60, %v1297_v28  ;;  %v1381_v63 = vpop.permute.xlu2 %1380 }
 0x282   : > { %v1306_v61 = vpop.permute.xlu1 %1305 }
 0x283   : > { %v1311_v3 = vadd.f32 %v1306_v61, %v1296_v53 }
 0x285   : > { %v1326_v6 = vadd.f32 %v1321_v56, %v1311_v3 }
 0x287   : > { %v1341_v9 = vadd.f32 %v1336_v1, %v1326_v6 }
 0x289   : > { %v1366_v4 = vpop.permute.xlu0 %1365  ;;  %v1398_v26 = vpop.permute.xlu2 %1397 }
 0x28a   : > { %v1323_v2 = vpop.permute.xlu1 %1322 }
 0x28b   : > { %v1327_v8 = vadd.f32 %v1323_v2, %v1312_v7 }
 0x28d   : > { %v1342_v15 = vadd.f32 %v1338_v0, %v1327_v8 }
 0x28f   : > { %v1357_v17 = vadd.f32 %v1353_v30, %v1342_v15 }
 0x291   : > { %v1383_v12 = vpop.permute.xlu0 %1382 }
 0x292   : > { %v1351_v5 = vpop.permute.xlu1 %1350 }
 0x293   : > { %v1356_v11 = vadd.f32 %v1351_v5, %v1341_v9 }
 0x295   : > { %v1371_v16 = vadd.f32 %v1366_v4, %v1356_v11 }
 0x297   : > { %v1386_v19 = vadd.f32 %v1381_v63, %v1371_v16 }
 0x299   : > { %v1411_v22 = vpop.permute.xlu0 %1410 }
 0x29a   : > { %v1368_v13 = vpop.permute.xlu1 %1367 }
 0x29b   : > { %v1372_v18 = vadd.f32 %v1368_v13, %v1357_v17 }
 0x29d   : > { %v1387_v23 = vadd.f32 %v1383_v12, %v1372_v18 }
 0x29f   : > { %v1402_v29 = vadd.f32 %v1398_v26, %v1387_v23 }
 0x2a2   : > { %v1396_v20 = vpop.permute.xlu1 %1395 }
 0x2a3   : > { %v1401_v21 = vadd.f32 %v1396_v20, %v1386_v19 }
 0x2a5   : > { %v1416_v24 = vadd.f32 %v1411_v22, %v1401_v21 }
 0x2a7   : > { %v1418_v25 = vmul.f32 %v1416_v24, %v1416_v24 }
 0x2a9   : > { %v1420_v27 = vsub.f32 0.0, %v1418_v25 }
 0x2aa   : > { %v1413_v31 = vpop.permute.xlu1 %1412 }
 0x2ab   : > { %v1422_v32 = vmul.f32 1.442695, %v1420_v27  ;;  %v1417_v34 = vadd.f32 %v1413_v31, %v1402_v29 }
 0x2ad   : > { %1699 = vpow2.f32 %v1422_v32  ;;  %v1419_v35 = vmul.f32 %v1417_v34, %v1417_v34 }
 0x2af   : > { %v1421_v57 = vsub.f32 0.0, %v1419_v35 }
 0x2b1   : > { %v1424_v36 = vmul.f32 1.442695, %v1421_v57 }
 0x2b3   : > { %v1700_v37 = vpop.eup %1699  ;;  %1701 = vpow2.f32 %v1424_v36 }
 0x2b4   : > { %v1428_v49 = vmul.f32 %v1700_v37, %v1426_v33 }
 0x2b6   : > { %1431 = vst.msk [vmem:[%s235_s15] sm:$0xff] %vm1430_vm2, %v1428_v49 }
 0x2b9   : > { %v1702_v45 = vpop.eup %1701 }
 0x2ba   : > { %v1429_v40 = vmul.f32 %v1702_v45, %v1427_v38 }
 0x2bc   : > { %1432 = vst.msk [vmem:[%s235_s15 + $0x8] sm:$0xff] %vm1430_vm2, %v1429_v40 }
 0x2bd   : > { %1790 = shalt.err (!%p1787_p0)
}
 0x2be   : > { %s1885_s24 = smov 128   ;;  %s1886_s28 = smov 8  }
 0x2bf   : > { %1596 = dma.vmem_to_hbm [thread:$0]  (%p1969_p8), %s1449_s16, 256, %s1451_s21, %s1434_s29, %s1885_s24, %s1885_s24, %s1886_s28  }
 0x2c0 PF: > { %s2695_s25 = sld [smem:[#allocation17_spill]] }
 0x2c1   : > { %s2696_s8 = sld [smem:[#allocation15_spill]] }
 0x2c6   : > { %p1618_p1 = scmp.ge.s32.totalorder %s2695_s25, 2 }
 0x2c7   : > { %s1465_s22 = sand.u32 1, %s2696_s8  }
 0x2c8   : > { %p1610_p2 = pnand %p1618_p1, %p1973_p9  ;;  %s1466_s19 = scalar_lea.sflag [#allocation5], %s1465_s22 }
 0x2ca   : > { %p1611_p4 = pneg %p1610_p2 }
 0x2cc   : > { %1836 = dma.done.wait (%p1611_p4), %s1466_s19, 256  }
 0x2cd   : > { %1838 = vsyncadd (%p1611_p4), %s1466_s19, 4294967040  ;;  %s21_s19 = sadd.s32 1, %s2695_s25   ;;  %s2698_s6 = smov %s2020_s12 }
 0x2ce   : > { %p18_p5 = scmp.ge.s32.totalorder %s21_s19, 10   ;;  %s2699_s15 = sld [smem:[#allocation16_spill]] }
 0x2cf   : > { %s2700_s17 = sld [smem:[#allocation19_spill]]  ;;  %s2701_s12 = smov %s1845_s13 }
 0x2d0   : > { %s2702_s13 = smov %s1849_s14  ;;  %s2703_s14 = smov %s2698_s6 }
 0x2d1   : > { %s2704_s16 = smov %s1865_s18  ;;  %s2705_s18 = smov %s2711_s20 }
 0x2d2   :  { %20 = sbr.rel (!%p18_p5) target bundleno = 12 (0xc), region = 87 }
 0x2d7   :  { %1472 = vsyncpa [#allocation4], 1 }
 0x2d8   :  { %1474 = vsyncpa [#allocation4 + $0x1], 1 }
 0x2d9   :  { %1475 = vsyncpa [#allocation5], 1 }
 0x2da   :  { %1477 = vsyncpa [#allocation5 + $0x1], 1 }
 0x2db   :  { %1478 = vsyncpa [#allocation6], 1 }
 0x2dc   :  { %1480 = vsyncpa [#allocation6 + $0x1], 1 }
 0x2dd   :  { %1481 = vsyncpa [#allocation7], 1 }
 0x2de   :  { %1483 = vsyncpa [#allocation7 + $0x1], 1 }

</bundles_post_ra>
